<compile_context>
chip_gen: v7x
topology: tpu7x:2x2x1
jax: 0.10.0
libtpu: 0.0.40
codegen_flags: <defaults>
</compile_context>

<pallas_src>
import functools

import jax
import jax.numpy as jnp
import numpy as np
from jax.experimental import pallas as pl
from jax.experimental.pallas import tpu as pltpu


# ------------------------------ fused kernel -------------------------------

def _fused_seq2seq_kernel(x_ref,                                  # (S*B, D)   time-major src, matmul dtype
                          w_ih_enc_ref, w_hh_enc_ref, b_enc_ref,  # (D,4H) (H,4H) (1,4H)
                          w_init_rec_ref, b_init_rec_ref,         # (H,4H) (1,4H)   folded step-0 weights
                          w_dec_comb_ref, b_dec_comb_ref,         # (H,8H) (1,8H)   folded recurrent + output
                          w_out_ref, b_out_ref,                   # (H,O)  (1,O)
                          out_ref,                                # (T, B, O) f32, time-major preds
                          zx_s):                                  # VMEM (S*B, 4H) f32 scratch
    T, B, O = out_ref.shape
    H = w_hh_enc_ref.shape[0]
    S = x_ref.shape[0] // B
    f32 = jnp.float32
    md = w_hh_enc_ref.dtype                 # matmul operand dtype (bf16 by default)

    def gates_update(z, c):
        # Two full-(B, 4H) vreg activation passes (EUP) + static lane slices; PyTorch gate
        # order (i, f, g, o) as lanes [0:H), [H:2H), [2H:3H), [3H:4H).  All elementwise
        # math stays f32 (v5e has no bf16 VALU/EUP).
        sg = jax.nn.sigmoid(z)
        th = jnp.tanh(z)
        i = sg[:, 0 * H:1 * H]
        f = sg[:, 1 * H:2 * H]
        g = th[:, 2 * H:3 * H]
        o = sg[:, 3 * H:4 * H]
        c_new = f * c + i * g
        h_new = o * jnp.tanh(c_new)
        return h_new, c_new

    # Hoist all (tiny) weights out of the recurrent loops — ~15 vregs total.
    w_hh_enc = w_hh_enc_ref[...]
    w_init_rec = w_init_rec_ref[...]
    b_init_rec = b_init_rec_ref[...]
    w_dec_comb = w_dec_comb_ref[...]
    b_dec_comb = b_dec_comb_ref[...]
    w_out = w_out_ref[...]
    b_out = b_out_ref[...]

    # ---- encoder input projection for ALL steps: one batched matmul, bias folded in ----
    zx_s[...] = (jnp.dot(x_ref[...], w_ih_enc_ref[...], preferred_element_type=f32)
                 + b_enc_ref[...])

    # ---- encoder recurrence: h/c carried as vregs, one dependent matmul per step -------
    h0 = jnp.zeros((B, H), f32)
    c0 = jnp.zeros((B, H), f32)

    def enc_body(t, hc):
        h, c = hc
        z = (zx_s[pl.ds(t * B, B), :]
             + jnp.dot(h.astype(md), w_hh_enc, preferred_element_type=f32))
        return gates_update(z, c)

    h, c = jax.lax.fori_loop(0, S, enc_body, (h0, c0), unroll=True)

    # ---- decoder (eval mode: no teacher forcing) ----------------------------------------
    # Step 0: init-linear folded into the recurrent weight:
    #   z_0 = init_linear(h_n) @ W_ih_dec + h_n @ W_hh_dec + b = h_n @ W_init_rec + b_init_rec
    z0 = jnp.dot(h.astype(md), w_init_rec, preferred_element_type=f32) + b_init_rec
    h, c = gates_update(z0, c)

    # Steps 1..T-1: the output projection is folded into the recurrence, so the single
    # 256-lane matmul per step yields z_t (lanes [0,4H)) AND the previous step's
    # prediction y_{t-1} (lanes [4H,4H+O)), which goes straight to the output block.
    def dec_body(t, hc):
        h, c = hc
        full = (jnp.dot(h.astype(md), w_dec_comb, preferred_element_type=f32)
                + b_dec_comb)
        out_ref[t - 1] = full[:, 4 * H:4 * H + O]      # y_{t-1}: off the recurrence path
        return gates_update(full[:, :4 * H], c)

    h, c = jax.lax.fori_loop(1, T, dec_body, (h, c), unroll=True)

    # Final prediction from the last hidden state (the only un-folded output matmul).
    out_ref[T - 1] = (jnp.dot(h.astype(md), w_out, preferred_element_type=f32) + b_out)


# -------------------------------- wrapper -----------------------------------

def _full_spec(shape):
    n = len(shape)
    return pl.BlockSpec(shape, lambda i, _n=n: (0,) * _n)


def pack_params(params, matmul_dtype=jnp.bfloat16):
    """One-time host-side packing + algebraic folding of the per-gate LSTM weights.

    All folds are computed in f32; only the matmul operands are cast to `matmul_dtype`
    (bf16 by default — single-pass MXU on v6e/v7x; pass jnp.float32 for strict accuracy).
    Biases stay f32 (added after the f32-accumulated dot).
    """
    def pack_gates(w_ih, w_hh, b):
        din, H = w_ih.shape[1], w_ih.shape[2]
        return (jnp.transpose(w_ih, (1, 0, 2)).reshape(din, 4 * H),
                jnp.transpose(w_hh, (1, 0, 2)).reshape(H, 4 * H),
                b.reshape(1, 4 * H))

    w_ih_e, w_hh_e, b_e = pack_gates(params["w_ih_enc"], params["w_hh_enc"], params["b_enc"])
    w_ih_d, w_hh_d, b_d = pack_gates(params["w_ih_dec"], params["w_hh_dec"], params["b_dec"])

    H = w_hh_e.shape[0]
    w_out_t, b_out = params["w_out_t"], params["b_out"]
    w_init_t, b_init = params["w_init_t"], params["b_init"]
    O = w_out_t.shape[1]

    # Exact algebraic folds (reassociates f32 rounding only):
    #   t>=1:  z_t = (h W_out + b_out) W_ih_dec + h W_hh_dec + b_dec = h W_dec_rec + b_dec_rec
    #   t==0:  z_0 = (h_n W_init + b_init) W_ih_dec + h_n W_hh_dec + b_dec
    w_dec_rec = w_hh_d + jnp.dot(w_out_t, w_ih_d)
    b_dec_rec = b_d + jnp.dot(b_out, w_ih_d)
    w_init_rec = w_hh_d + jnp.dot(w_init_t, w_ih_d)
    b_init_rec = b_d + jnp.dot(b_init, w_ih_d)

    # 256-lane combined decoder weight: lanes [0,4H) -> z_t, lanes [4H,4H+O) -> y_{t-1}.
    # (H=32 -> 4H=128, so the output projection is padded to exactly one extra lane width.)
    w_out_pad = jnp.zeros((H, 4 * H), jnp.float32).at[:, :O].set(w_out_t)
    b_out_pad = jnp.zeros((1, 4 * H), jnp.float32).at[:, :O].set(b_out)
    w_dec_comb = jnp.concatenate([w_dec_rec, w_out_pad], axis=1)   # (H, 8H)
    b_dec_comb = jnp.concatenate([b_dec_rec, b_out_pad], axis=1)   # (1, 8H)

    md = matmul_dtype
    return {
        "w_ih_enc": w_ih_e.astype(md), "w_hh_enc": w_hh_e.astype(md), "b_enc": b_e,
        "w_init_rec": w_init_rec.astype(md), "b_init_rec": b_init_rec,
        "w_dec_comb": w_dec_comb.astype(md), "b_dec_comb": b_dec_comb,
        "w_out_t": w_out_t.astype(md), "b_out": b_out,
    }


def forecasting_forward(src, packed, target_len):
    """src: (B, S, D) float32 -> (B, target_len, O) float32."""
    B, S, D = src.shape
    H = packed["w_hh_enc"].shape[0]
    O = packed["w_out_t"].shape[1]
    f32 = jnp.float32

    # Time-major and flattened to (S*B, D) so the encoder input projection is ONE batched
    # matmul inside the kernel; cast to the matmul operand dtype host-side.
    x_flat = jnp.transpose(src, (1, 0, 2)).reshape(S * B, D).astype(packed["w_ih_enc"].dtype)

    out_tm = pl.pallas_call(
        _fused_seq2seq_kernel,
        grid=(1,),
        in_specs=[
            _full_spec((S * B, D)),
            _full_spec((D, 4 * H)), _full_spec((H, 4 * H)), _full_spec((1, 4 * H)),
            _full_spec((H, 4 * H)), _full_spec((1, 4 * H)),
            _full_spec((H, 8 * H)), _full_spec((1, 8 * H)),
            _full_spec((H, O)), _full_spec((1, O)),
        ],
        out_specs=pl.BlockSpec((target_len, B, O), lambda i: (0, 0, 0)),
        out_shape=jax.ShapeDtypeStruct((target_len, B, O), f32),
        scratch_shapes=[pltpu.VMEM((S * B, 4 * H), f32)],    # precomputed encoder x-projection
        compiler_params=pltpu.CompilerParams(
            dimension_semantics=("arbitrary",)),              # sequential recurrence
    )(x_flat,
      packed["w_ih_enc"], packed["w_hh_enc"], packed["b_enc"],
      packed["w_init_rec"], packed["b_init_rec"],
      packed["w_dec_comb"], packed["b_dec_comb"],
      packed["w_out_t"], packed["b_out"])

    # TODO(synk): for production batches >> 2, add a batch-block grid axis marked
    # "parallel" (re-initializing h/c per block) to use both v7x TensorCores, and size the
    # per-invocation batch in multiples of 8 (f32) / 16 (bf16) sublanes.
    return jnp.transpose(out_tm, (1, 0, 2))               # (B, target_len, O)


# ---------------------------- pure-JAX reference -----------------------------

def reference_forward(src, P, target_len):
    hp = jax.lax.Precision.HIGHEST

    def cell(x, h, c, w_ih, w_hh, b):
        def gate(k):
            return (jnp.dot(x, w_ih[k], precision=hp)
                    + jnp.dot(h, w_hh[k], precision=hp) + b[k])
        i = jax.nn.sigmoid(gate(0)); f = jax.nn.sigmoid(gate(1))
        g = jnp.tanh(gate(2)); o = jax.nn.sigmoid(gate(3))
        c = f * c + i * g
        return o * jnp.tanh(c), c

    B, S, D = src.shape
    H = P["w_hh_enc"].shape[-1]
    h = jnp.zeros((B, H), jnp.float32)
    c = jnp.zeros((B, H), jnp.float32)
    enc = []
    for t in range(S):
        h, c = cell(src[:, t], h, c, P["w_ih_enc"], P["w_hh_enc"], P["b_enc"])
        enc.append(h)
    x = jnp.dot(enc[-1], P["w_init_t"], precision=hp) + P["b_init"]
    outs = []
    for _ in range(target_len):
        h, c = cell(x, h, c, P["w_ih_dec"], P["w_hh_dec"], P["b_dec"])
        y = jnp.dot(h, P["w_out_t"], precision=hp) + P["b_out"]
        outs.append(y)
        x = y
    return jnp.stack(outs, axis=1)


# ----------------------------------- main ------------------------------------

if __name__ == "__main__":
    B, S, D = 2, 8, 4           # batch, source seq len, input features
    H = 32                      # hidden_size  (4H = 128 -> exactly one lane width)
    O = 4                       # output_size
    TARGET_LEN = 5              # target_len

    key = jax.random.PRNGKey(0)
    ks = jax.random.split(key, 12)

    def U(k, shape, fan_in):
        bound = 1.0 / np.sqrt(fan_in)
        return jax.random.uniform(k, shape, jnp.float32, -bound, bound)

    # Encoder LSTM (input D -> hidden H), gate order (i, f, g, o).
    # Decoder LSTM (input O -> hidden H). Biases = b_ih + b_hh folded together.
    params = {
        "w_ih_enc": U(ks[0], (4, D, H), H),
        "w_hh_enc": U(ks[1], (4, H, H), H),
        "b_enc":    U(ks[2], (4, 1, H), H),
        "w_ih_dec": U(ks[3], (4, O, H), H),
        "w_hh_dec": U(ks[4], (4, H, H), H),
        "b_dec":    U(ks[5], (4, 1, H), H),
        # init_decoder_input_layer: nn.Linear(H, O)   (stored pre-transposed)
        "w_init_t": U(ks[6], (H, O), H),
        "b_init":   U(ks[7], (1, O), H),
        # output_layer: nn.Linear(H, O)               (stored pre-transposed)
        "w_out_t":  U(ks[8], (H, O), H),
        "b_out":    U(ks[9], (1, O), H),
    }

    src = jax.random.normal(ks[10], (B, S, D), jnp.float32)

    packed = pack_params(params)                               # one-time packing + folding
    fwd = jax.jit(functools.partial(forecasting_forward, target_len=TARGET_LEN))

    out = jax.block_until_ready(fwd(src, packed))

    ref = jax.block_until_ready(reference_forward(src, params, TARGET_LEN))
    assert out.shape == (B, TARGET_LEN, O), out.shape
    # bf16 matmul operands (f32 accumulation) over 13 recurrent steps vs. an f32 HIGHEST
    # reference: use the standard bf16 tolerance. Pass matmul_dtype=jnp.float32 to
    # pack_params to tighten this back to ~2e-3.
    err = float(np.max(np.abs(np.asarray(out) - np.asarray(ref))))
    assert np.allclose(np.asarray(out), np.asarray(ref), rtol=2e-2, atol=2e-2), err

    # TODO(synk): teacher forcing / scheduled sampling, attention, VAE-KL and
    # multi-encoder-decoder branches of ForecastingModel are config-dependent
    # training-time paths and are not exercised in this eval-mode kernel.
    print("KERNEL_OK")
</pallas_src>

<mosaic_0001>
module attributes {stable_mosaic.version = 11 : i64} {
  func.func @_fused_seq2seq_kernel(%arg0: i32, %arg1: memref<16x4xbf16, #tpu.memory_space<vmem>>, %arg2: memref<4x128xbf16, #tpu.memory_space<vmem>>, %arg3: memref<32x128xbf16, #tpu.memory_space<vmem>>, %arg4: memref<1x128xf32, #tpu.memory_space<vmem>>, %arg5: memref<32x128xbf16, #tpu.memory_space<vmem>>, %arg6: memref<1x128xf32, #tpu.memory_space<vmem>>, %arg7: memref<32x256xbf16, #tpu.memory_space<vmem>>, %arg8: memref<1x256xf32, #tpu.memory_space<vmem>>, %arg9: memref<32x4xbf16, #tpu.memory_space<vmem>>, %arg10: memref<1x4xf32, #tpu.memory_space<vmem>>, %arg11: memref<5x2x4xf32, #tpu.memory_space<vmem>>, %arg12: memref<16x128xf32, #tpu.memory_space<vmem>>) attributes {dimension_semantics = [#tpu.dimension_semantics<arbitrary>], iteration_bounds = array<i64: 1>, scalar_prefetch = 0 : i64, scratch_operands = 1 : i64, tpu.core_type = #tpu.core_type<tc>, window_params = [{pipeline_mode = #tpu.pipeline_mode<synchronous>, transform_indices = @transform_0, window_bounds = array<i64: 16, 4>}, {pipeline_mode = #tpu.pipeline_mode<synchronous>, transform_indices = @transform_1, window_bounds = array<i64: 4, 128>}, {pipeline_mode = #tpu.pipeline_mode<synchronous>, transform_indices = @transform_2, window_bounds = array<i64: 32, 128>}, {pipeline_mode = #tpu.pipeline_mode<synchronous>, transform_indices = @transform_3, window_bounds = array<i64: 1, 128>}, {pipeline_mode = #tpu.pipeline_mode<synchronous>, transform_indices = @transform_4, window_bounds = array<i64: 32, 128>}, {pipeline_mode = #tpu.pipeline_mode<synchronous>, transform_indices = @transform_5, window_bounds = array<i64: 1, 128>}, {pipeline_mode = #tpu.pipeline_mode<synchronous>, transform_indices = @transform_6, window_bounds = array<i64: 32, 256>}, {pipeline_mode = #tpu.pipeline_mode<synchronous>, transform_indices = @transform_7, window_bounds = array<i64: 1, 256>}, {pipeline_mode = #tpu.pipeline_mode<synchronous>, transform_indices = @transform_8, window_bounds = array<i64: 32, 4>}, {pipeline_mode = #tpu.pipeline_mode<synchronous>, transform_indices = @transform_9, window_bounds = array<i64: 1, 4>}, {pipeline_mode = #tpu.pipeline_mode<synchronous>, transform_indices = @transform_10, window_bounds = array<i64: 5, 2, 4>}]} {
    %c0 = arith.constant 0 : index
    %c0_0 = arith.constant 0 : index
    %0 = vector.load %arg3[%c0, %c0_0] : memref<32x128xbf16, #tpu.memory_space<vmem>>, vector<32x128xbf16>
    %c0_1 = arith.constant 0 : index
    %c0_2 = arith.constant 0 : index
    %1 = vector.load %arg5[%c0_1, %c0_2] : memref<32x128xbf16, #tpu.memory_space<vmem>>, vector<32x128xbf16>
    %c0_3 = arith.constant 0 : index
    %c0_4 = arith.constant 0 : index
    %2 = vector.load %arg6[%c0_3, %c0_4] : memref<1x128xf32, #tpu.memory_space<vmem>>, vector<1x128xf32>
    %c0_5 = arith.constant 0 : index
    %c0_6 = arith.constant 0 : index
    %3 = vector.load %arg7[%c0_5, %c0_6] : memref<32x256xbf16, #tpu.memory_space<vmem>>, vector<32x256xbf16>
    %c0_7 = arith.constant 0 : index
    %c0_8 = arith.constant 0 : index
    %4 = vector.load %arg8[%c0_7, %c0_8] : memref<1x256xf32, #tpu.memory_space<vmem>>, vector<1x256xf32>
    %c0_9 = arith.constant 0 : index
    %c0_10 = arith.constant 0 : index
    %5 = vector.load %arg9[%c0_9, %c0_10] : memref<32x4xbf16, #tpu.memory_space<vmem>>, vector<32x4xbf16>
    %c0_11 = arith.constant 0 : index
    %c0_12 = arith.constant 0 : index
    %6 = vector.load %arg10[%c0_11, %c0_12] : memref<1x4xf32, #tpu.memory_space<vmem>>, vector<1x4xf32>
    %c0_13 = arith.constant 0 : index
    %c0_14 = arith.constant 0 : index
    %7 = vector.load %arg1[%c0_13, %c0_14] : memref<16x4xbf16, #tpu.memory_space<vmem>>, vector<16x4xbf16>
    %c0_15 = arith.constant 0 : index
    %c0_16 = arith.constant 0 : index
    %8 = vector.load %arg2[%c0_15, %c0_16] : memref<4x128xbf16, #tpu.memory_space<vmem>>, vector<4x128xbf16>
    %cst = arith.constant dense<0.000000e+00> : vector<16x128xf32>
    %9 = tpu.matmul %7, %8, %cst {dimension_numbers = #tpu.dot_dimension_numbers<[1], [0], [0], [1], [0, 0, 1, 1], [], []>} : vector<16x4xbf16>, vector<4x128xbf16>, vector<16x128xf32> -> vector<16x128xf32>
    %c0_17 = arith.constant 0 : index
    %c0_18 = arith.constant 0 : index
    %10 = vector.load %arg4[%c0_17, %c0_18] : memref<1x128xf32, #tpu.memory_space<vmem>>, vector<1x128xf32>
    %11 = vector.broadcast %10 : vector<1x128xf32> to vector<16x128xf32>
    %12 = arith.addf %9, %11 : vector<16x128xf32>
    %c0_19 = arith.constant 0 : index
    %c0_20 = arith.constant 0 : index
    %13 = vector.load %arg12[%c0_19, %c0_20] : memref<16x128xf32, #tpu.memory_space<vmem>>, vector<16x128xf32>
    tpu.vector_store %arg12[%c0_19, %c0_20], %12 {strides = array<i32>} : memref<16x128xf32, #tpu.memory_space<vmem>>, vector<16x128xf32>,
    %cst_21 = arith.constant 0.000000e+00 : f32
    %14 = vector.broadcast %cst_21 : f32 to vector<2x32xf32>
    %cst_22 = arith.constant 0.000000e+00 : f32
    %15 = vector.broadcast %cst_22 : f32 to vector<2x32xf32>
    %c0_i32 = arith.constant 0 : i32
    %c2_i32 = arith.constant 2 : i32
    %16 = arith.muli %c0_i32, %c2_i32 : i32
    %17 = arith.index_cast %16 : i32 to index
    %c0_23 = arith.constant 0 : index
    %18 = vector.load %arg12[%17, %c0_23] : memref<16x128xf32, #tpu.memory_space<vmem>>, vector<2x128xf32>
    %19 = arith.truncf %14 : vector<2x32xf32> to vector<2x32xbf16>
    %cst_24 = arith.constant dense<0.000000e+00> : vector<2x128xf32>
    %20 = tpu.matmul %19, %0, %cst_24 {dimension_numbers = #tpu.dot_dimension_numbers<[1], [0], [0], [1], [0, 0, 1, 1], [], []>} : vector<2x32xbf16>, vector<32x128xbf16>, vector<2x128xf32> -> vector<2x128xf32>
    %21 = arith.addf %18, %20 : vector<2x128xf32>
    %22 = arith.negf %21 : vector<2x128xf32>
    %23 = math.exp %22 : vector<2x128xf32>
    %cst_25 = arith.constant 1.000000e+00 : f32
    %24 = vector.broadcast %cst_25 : f32 to vector<2x128xf32>
    %25 = arith.addf %24, %23 : vector<2x128xf32>
    %26 = arith.divf %24, %25 : vector<2x128xf32>
    %27 = math.tanh %21 : vector<2x128xf32>
    %28 = vector.extract_strided_slice %26 {offsets = [0, 0], sizes = [2, 32], strides = [1, 1]} : vector<2x128xf32> to vector<2x32xf32>
    %29 = vector.extract_strided_slice %26 {offsets = [0, 32], sizes = [2, 32], strides = [1, 1]} : vector<2x128xf32> to vector<2x32xf32>
    %30 = vector.extract_strided_slice %27 {offsets = [0, 64], sizes = [2, 32], strides = [1, 1]} : vector<2x128xf32> to vector<2x32xf32>
    %31 = vector.extract_strided_slice %26 {offsets = [0, 96], sizes = [2, 32], strides = [1, 1]} : vector<2x128xf32> to vector<2x32xf32>
    %32 = arith.mulf %29, %15 : vector<2x32xf32>
    %33 = arith.mulf %28, %30 : vector<2x32xf32>
    %34 = arith.addf %32, %33 : vector<2x32xf32>
    %35 = math.tanh %34 : vector<2x32xf32>
    %36 = arith.mulf %31, %35 : vector<2x32xf32>
    %c1_i32 = arith.constant 1 : i32
    %c2_i32_26 = arith.constant 2 : i32
    %37 = arith.muli %c1_i32, %c2_i32_26 : i32
    %38 = arith.index_cast %37 : i32 to index
    %c0_27 = arith.constant 0 : index
    %39 = vector.load %arg12[%38, %c0_27] : memref<16x128xf32, #tpu.memory_space<vmem>>, vector<2x128xf32>
    %40 = arith.truncf %36 : vector<2x32xf32> to vector<2x32xbf16>
    %cst_28 = arith.constant dense<0.000000e+00> : vector<2x128xf32>
    %41 = tpu.matmul %40, %0, %cst_28 {dimension_numbers = #tpu.dot_dimension_numbers<[1], [0], [0], [1], [0, 0, 1, 1], [], []>} : vector<2x32xbf16>, vector<32x128xbf16>, vector<2x128xf32> -> vector<2x128xf32>
    %42 = arith.addf %39, %41 : vector<2x128xf32>
    %43 = arith.negf %42 : vector<2x128xf32>
    %44 = math.exp %43 : vector<2x128xf32>
    %cst_29 = arith.constant 1.000000e+00 : f32
    %45 = vector.broadcast %cst_29 : f32 to vector<2x128xf32>
    %46 = arith.addf %45, %44 : vector<2x128xf32>
    %47 = arith.divf %45, %46 : vector<2x128xf32>
    %48 = math.tanh %42 : vector<2x128xf32>
    %49 = vector.extract_strided_slice %47 {offsets = [0, 0], sizes = [2, 32], strides = [1, 1]} : vector<2x128xf32> to vector<2x32xf32>
    %50 = vector.extract_strided_slice %47 {offsets = [0, 32], sizes = [2, 32], strides = [1, 1]} : vector<2x128xf32> to vector<2x32xf32>
    %51 = vector.extract_strided_slice %48 {offsets = [0, 64], sizes = [2, 32], strides = [1, 1]} : vector<2x128xf32> to vector<2x32xf32>
    %52 = vector.extract_strided_slice %47 {offsets = [0, 96], sizes = [2, 32], strides = [1, 1]} : vector<2x128xf32> to vector<2x32xf32>
    %53 = arith.mulf %50, %34 : vector<2x32xf32>
    %54 = arith.mulf %49, %51 : vector<2x32xf32>
    %55 = arith.addf %53, %54 : vector<2x32xf32>
    %56 = math.tanh %55 : vector<2x32xf32>
    %57 = arith.mulf %52, %56 : vector<2x32xf32>
    %c2_i32_30 = arith.constant 2 : i32
    %c2_i32_31 = arith.constant 2 : i32
    %58 = arith.muli %c2_i32_30, %c2_i32_31 : i32
    %59 = arith.index_cast %58 : i32 to index
    %c0_32 = arith.constant 0 : index
    %60 = vector.load %arg12[%59, %c0_32] : memref<16x128xf32, #tpu.memory_space<vmem>>, vector<2x128xf32>
    %61 = arith.truncf %57 : vector<2x32xf32> to vector<2x32xbf16>
    %cst_33 = arith.constant dense<0.000000e+00> : vector<2x128xf32>
    %62 = tpu.matmul %61, %0, %cst_33 {dimension_numbers = #tpu.dot_dimension_numbers<[1], [0], [0], [1], [0, 0, 1, 1], [], []>} : vector<2x32xbf16>, vector<32x128xbf16>, vector<2x128xf32> -> vector<2x128xf32>
    %63 = arith.addf %60, %62 : vector<2x128xf32>
    %64 = arith.negf %63 : vector<2x128xf32>
    %65 = math.exp %64 : vector<2x128xf32>
    %cst_34 = arith.constant 1.000000e+00 : f32
    %66 = vector.broadcast %cst_34 : f32 to vector<2x128xf32>
    %67 = arith.addf %66, %65 : vector<2x128xf32>
    %68 = arith.divf %66, %67 : vector<2x128xf32>
    %69 = math.tanh %63 : vector<2x128xf32>
    %70 = vector.extract_strided_slice %68 {offsets = [0, 0], sizes = [2, 32], strides = [1, 1]} : vector<2x128xf32> to vector<2x32xf32>
    %71 = vector.extract_strided_slice %68 {offsets = [0, 32], sizes = [2, 32], strides = [1, 1]} : vector<2x128xf32> to vector<2x32xf32>
    %72 = vector.extract_strided_slice %69 {offsets = [0, 64], sizes = [2, 32], strides = [1, 1]} : vector<2x128xf32> to vector<2x32xf32>
    %73 = vector.extract_strided_slice %68 {offsets = [0, 96], sizes = [2, 32], strides = [1, 1]} : vector<2x128xf32> to vector<2x32xf32>
    %74 = arith.mulf %71, %55 : vector<2x32xf32>
    %75 = arith.mulf %70, %72 : vector<2x32xf32>
    %76 = arith.addf %74, %75 : vector<2x32xf32>
    %77 = math.tanh %76 : vector<2x32xf32>
    %78 = arith.mulf %73, %77 : vector<2x32xf32>
    %c3_i32 = arith.constant 3 : i32
    %c2_i32_35 = arith.constant 2 : i32
    %79 = arith.muli %c3_i32, %c2_i32_35 : i32
    %80 = arith.index_cast %79 : i32 to index
    %c0_36 = arith.constant 0 : index
    %81 = vector.load %arg12[%80, %c0_36] : memref<16x128xf32, #tpu.memory_space<vmem>>, vector<2x128xf32>
    %82 = arith.truncf %78 : vector<2x32xf32> to vector<2x32xbf16>
    %cst_37 = arith.constant dense<0.000000e+00> : vector<2x128xf32>
    %83 = tpu.matmul %82, %0, %cst_37 {dimension_numbers = #tpu.dot_dimension_numbers<[1], [0], [0], [1], [0, 0, 1, 1], [], []>} : vector<2x32xbf16>, vector<32x128xbf16>, vector<2x128xf32> -> vector<2x128xf32>
    %84 = arith.addf %81, %83 : vector<2x128xf32>
    %85 = arith.negf %84 : vector<2x128xf32>
    %86 = math.exp %85 : vector<2x128xf32>
    %cst_38 = arith.constant 1.000000e+00 : f32
    %87 = vector.broadcast %cst_38 : f32 to vector<2x128xf32>
    %88 = arith.addf %87, %86 : vector<2x128xf32>
    %89 = arith.divf %87, %88 : vector<2x128xf32>
    %90 = math.tanh %84 : vector<2x128xf32>
    %91 = vector.extract_strided_slice %89 {offsets = [0, 0], sizes = [2, 32], strides = [1, 1]} : vector<2x128xf32> to vector<2x32xf32>
    %92 = vector.extract_strided_slice %89 {offsets = [0, 32], sizes = [2, 32], strides = [1, 1]} : vector<2x128xf32> to vector<2x32xf32>
    %93 = vector.extract_strided_slice %90 {offsets = [0, 64], sizes = [2, 32], strides = [1, 1]} : vector<2x128xf32> to vector<2x32xf32>
    %94 = vector.extract_strided_slice %89 {offsets = [0, 96], sizes = [2, 32], strides = [1, 1]} : vector<2x128xf32> to vector<2x32xf32>
    %95 = arith.mulf %92, %76 : vector<2x32xf32>
    %96 = arith.mulf %91, %93 : vector<2x32xf32>
    %97 = arith.addf %95, %96 : vector<2x32xf32>
    %98 = math.tanh %97 : vector<2x32xf32>
    %99 = arith.mulf %94, %98 : vector<2x32xf32>
    %c4_i32 = arith.constant 4 : i32
    %c2_i32_39 = arith.constant 2 : i32
    %100 = arith.muli %c4_i32, %c2_i32_39 : i32
    %101 = arith.index_cast %100 : i32 to index
    %c0_40 = arith.constant 0 : index
    %102 = vector.load %arg12[%101, %c0_40] : memref<16x128xf32, #tpu.memory_space<vmem>>, vector<2x128xf32>
    %103 = arith.truncf %99 : vector<2x32xf32> to vector<2x32xbf16>
    %cst_41 = arith.constant dense<0.000000e+00> : vector<2x128xf32>
    %104 = tpu.matmul %103, %0, %cst_41 {dimension_numbers = #tpu.dot_dimension_numbers<[1], [0], [0], [1], [0, 0, 1, 1], [], []>} : vector<2x32xbf16>, vector<32x128xbf16>, vector<2x128xf32> -> vector<2x128xf32>
    %105 = arith.addf %102, %104 : vector<2x128xf32>
    %106 = arith.negf %105 : vector<2x128xf32>
    %107 = math.exp %106 : vector<2x128xf32>
    %cst_42 = arith.constant 1.000000e+00 : f32
    %108 = vector.broadcast %cst_42 : f32 to vector<2x128xf32>
    %109 = arith.addf %108, %107 : vector<2x128xf32>
    %110 = arith.divf %108, %109 : vector<2x128xf32>
    %111 = math.tanh %105 : vector<2x128xf32>
    %112 = vector.extract_strided_slice %110 {offsets = [0, 0], sizes = [2, 32], strides = [1, 1]} : vector<2x128xf32> to vector<2x32xf32>
    %113 = vector.extract_strided_slice %110 {offsets = [0, 32], sizes = [2, 32], strides = [1, 1]} : vector<2x128xf32> to vector<2x32xf32>
    %114 = vector.extract_strided_slice %111 {offsets = [0, 64], sizes = [2, 32], strides = [1, 1]} : vector<2x128xf32> to vector<2x32xf32>
    %115 = vector.extract_strided_slice %110 {offsets = [0, 96], sizes = [2, 32], strides = [1, 1]} : vector<2x128xf32> to vector<2x32xf32>
    %116 = arith.mulf %113, %97 : vector<2x32xf32>
    %117 = arith.mulf %112, %114 : vector<2x32xf32>
    %118 = arith.addf %116, %117 : vector<2x32xf32>
    %119 = math.tanh %118 : vector<2x32xf32>
    %120 = arith.mulf %115, %119 : vector<2x32xf32>
    %c5_i32 = arith.constant 5 : i32
    %c2_i32_43 = arith.constant 2 : i32
    %121 = arith.muli %c5_i32, %c2_i32_43 : i32
    %122 = arith.index_cast %121 : i32 to index
    %c0_44 = arith.constant 0 : index
    %123 = vector.load %arg12[%122, %c0_44] : memref<16x128xf32, #tpu.memory_space<vmem>>, vector<2x128xf32>
    %124 = arith.truncf %120 : vector<2x32xf32> to vector<2x32xbf16>
    %cst_45 = arith.constant dense<0.000000e+00> : vector<2x128xf32>
    %125 = tpu.matmul %124, %0, %cst_45 {dimension_numbers = #tpu.dot_dimension_numbers<[1], [0], [0], [1], [0, 0, 1, 1], [], []>} : vector<2x32xbf16>, vector<32x128xbf16>, vector<2x128xf32> -> vector<2x128xf32>
    %126 = arith.addf %123, %125 : vector<2x128xf32>
    %127 = arith.negf %126 : vector<2x128xf32>
    %128 = math.exp %127 : vector<2x128xf32>
    %cst_46 = arith.constant 1.000000e+00 : f32
    %129 = vector.broadcast %cst_46 : f32 to vector<2x128xf32>
    %130 = arith.addf %129, %128 : vector<2x128xf32>
    %131 = arith.divf %129, %130 : vector<2x128xf32>
    %132 = math.tanh %126 : vector<2x128xf32>
    %133 = vector.extract_strided_slice %131 {offsets = [0, 0], sizes = [2, 32], strides = [1, 1]} : vector<2x128xf32> to vector<2x32xf32>
    %134 = vector.extract_strided_slice %131 {offsets = [0, 32], sizes = [2, 32], strides = [1, 1]} : vector<2x128xf32> to vector<2x32xf32>
    %135 = vector.extract_strided_slice %132 {offsets = [0, 64], sizes = [2, 32], strides = [1, 1]} : vector<2x128xf32> to vector<2x32xf32>
    %136 = vector.extract_strided_slice %131 {offsets = [0, 96], sizes = [2, 32], strides = [1, 1]} : vector<2x128xf32> to vector<2x32xf32>
    %137 = arith.mulf %134, %118 : vector<2x32xf32>
    %138 = arith.mulf %133, %135 : vector<2x32xf32>
    %139 = arith.addf %137, %138 : vector<2x32xf32>
    %140 = math.tanh %139 : vector<2x32xf32>
    %141 = arith.mulf %136, %140 : vector<2x32xf32>
    %c6_i32 = arith.constant 6 : i32
    %c2_i32_47 = arith.constant 2 : i32
    %142 = arith.muli %c6_i32, %c2_i32_47 : i32
    %143 = arith.index_cast %142 : i32 to index
    %c0_48 = arith.constant 0 : index
    %144 = vector.load %arg12[%143, %c0_48] : memref<16x128xf32, #tpu.memory_space<vmem>>, vector<2x128xf32>
    %145 = arith.truncf %141 : vector<2x32xf32> to vector<2x32xbf16>
    %cst_49 = arith.constant dense<0.000000e+00> : vector<2x128xf32>
    %146 = tpu.matmul %145, %0, %cst_49 {dimension_numbers = #tpu.dot_dimension_numbers<[1], [0], [0], [1], [0, 0, 1, 1], [], []>} : vector<2x32xbf16>, vector<32x128xbf16>, vector<2x128xf32> -> vector<2x128xf32>
    %147 = arith.addf %144, %146 : vector<2x128xf32>
    %148 = arith.negf %147 : vector<2x128xf32>
    %149 = math.exp %148 : vector<2x128xf32>
    %cst_50 = arith.constant 1.000000e+00 : f32
    %150 = vector.broadcast %cst_50 : f32 to vector<2x128xf32>
    %151 = arith.addf %150, %149 : vector<2x128xf32>
    %152 = arith.divf %150, %151 : vector<2x128xf32>
    %153 = math.tanh %147 : vector<2x128xf32>
    %154 = vector.extract_strided_slice %152 {offsets = [0, 0], sizes = [2, 32], strides = [1, 1]} : vector<2x128xf32> to vector<2x32xf32>
    %155 = vector.extract_strided_slice %152 {offsets = [0, 32], sizes = [2, 32], strides = [1, 1]} : vector<2x128xf32> to vector<2x32xf32>
    %156 = vector.extract_strided_slice %153 {offsets = [0, 64], sizes = [2, 32], strides = [1, 1]} : vector<2x128xf32> to vector<2x32xf32>
    %157 = vector.extract_strided_slice %152 {offsets = [0, 96], sizes = [2, 32], strides = [1, 1]} : vector<2x128xf32> to vector<2x32xf32>
    %158 = arith.mulf %155, %139 : vector<2x32xf32>
    %159 = arith.mulf %154, %156 : vector<2x32xf32>
    %160 = arith.addf %158, %159 : vector<2x32xf32>
    %161 = math.tanh %160 : vector<2x32xf32>
    %162 = arith.mulf %157, %161 : vector<2x32xf32>
    %c7_i32 = arith.constant 7 : i32
    %c2_i32_51 = arith.constant 2 : i32
    %163 = arith.muli %c7_i32, %c2_i32_51 : i32
    %164 = arith.index_cast %163 : i32 to index
    %c0_52 = arith.constant 0 : index
    %165 = vector.load %arg12[%164, %c0_52] : memref<16x128xf32, #tpu.memory_space<vmem>>, vector<2x128xf32>
    %166 = arith.truncf %162 : vector<2x32xf32> to vector<2x32xbf16>
    %cst_53 = arith.constant dense<0.000000e+00> : vector<2x128xf32>
    %167 = tpu.matmul %166, %0, %cst_53 {dimension_numbers = #tpu.dot_dimension_numbers<[1], [0], [0], [1], [0, 0, 1, 1], [], []>} : vector<2x32xbf16>, vector<32x128xbf16>, vector<2x128xf32> -> vector<2x128xf32>
    %168 = arith.addf %165, %167 : vector<2x128xf32>
    %169 = arith.negf %168 : vector<2x128xf32>
    %170 = math.exp %169 : vector<2x128xf32>
    %cst_54 = arith.constant 1.000000e+00 : f32
    %171 = vector.broadcast %cst_54 : f32 to vector<2x128xf32>
    %172 = arith.addf %171, %170 : vector<2x128xf32>
    %173 = arith.divf %171, %172 : vector<2x128xf32>
    %174 = math.tanh %168 : vector<2x128xf32>
    %175 = vector.extract_strided_slice %173 {offsets = [0, 0], sizes = [2, 32], strides = [1, 1]} : vector<2x128xf32> to vector<2x32xf32>
    %176 = vector.extract_strided_slice %173 {offsets = [0, 32], sizes = [2, 32], strides = [1, 1]} : vector<2x128xf32> to vector<2x32xf32>
    %177 = vector.extract_strided_slice %174 {offsets = [0, 64], sizes = [2, 32], strides = [1, 1]} : vector<2x128xf32> to vector<2x32xf32>
    %178 = vector.extract_strided_slice %173 {offsets = [0, 96], sizes = [2, 32], strides = [1, 1]} : vector<2x128xf32> to vector<2x32xf32>
    %179 = arith.mulf %176, %160 : vector<2x32xf32>
    %180 = arith.mulf %175, %177 : vector<2x32xf32>
    %181 = arith.addf %179, %180 : vector<2x32xf32>
    %182 = math.tanh %181 : vector<2x32xf32>
    %183 = arith.mulf %178, %182 : vector<2x32xf32>
    %c8_i32 = arith.constant 8 : i32
    %184 = arith.truncf %183 : vector<2x32xf32> to vector<2x32xbf16>
    %cst_55 = arith.constant dense<0.000000e+00> : vector<2x128xf32>
    %185 = tpu.matmul %184, %1, %cst_55 {dimension_numbers = #tpu.dot_dimension_numbers<[1], [0], [0], [1], [0, 0, 1, 1], [], []>} : vector<2x32xbf16>, vector<32x128xbf16>, vector<2x128xf32> -> vector<2x128xf32>
    %186 = vector.broadcast %2 : vector<1x128xf32> to vector<2x128xf32>
    %187 = arith.addf %185, %186 : vector<2x128xf32>
    %188 = arith.negf %187 : vector<2x128xf32>
    %189 = math.exp %188 : vector<2x128xf32>
    %cst_56 = arith.constant 1.000000e+00 : f32
    %190 = vector.broadcast %cst_56 : f32 to vector<2x128xf32>
    %191 = arith.addf %190, %189 : vector<2x128xf32>
    %192 = arith.divf %190, %191 : vector<2x128xf32>
    %193 = math.tanh %187 : vector<2x128xf32>
    %194 = vector.extract_strided_slice %192 {offsets = [0, 0], sizes = [2, 32], strides = [1, 1]} : vector<2x128xf32> to vector<2x32xf32>
    %195 = vector.extract_strided_slice %192 {offsets = [0, 32], sizes = [2, 32], strides = [1, 1]} : vector<2x128xf32> to vector<2x32xf32>
    %196 = vector.extract_strided_slice %193 {offsets = [0, 64], sizes = [2, 32], strides = [1, 1]} : vector<2x128xf32> to vector<2x32xf32>
    %197 = vector.extract_strided_slice %192 {offsets = [0, 96], sizes = [2, 32], strides = [1, 1]} : vector<2x128xf32> to vector<2x32xf32>
    %198 = arith.mulf %195, %181 : vector<2x32xf32>
    %199 = arith.mulf %194, %196 : vector<2x32xf32>
    %200 = arith.addf %198, %199 : vector<2x32xf32>
    %201 = math.tanh %200 : vector<2x32xf32>
    %202 = arith.mulf %197, %201 : vector<2x32xf32>
    %c1_i32_57 = arith.constant 1 : i32
    %203 = arith.truncf %202 : vector<2x32xf32> to vector<2x32xbf16>
    %cst_58 = arith.constant dense<0.000000e+00> : vector<2x256xf32>
    %204 = tpu.matmul %203, %3, %cst_58 {dimension_numbers = #tpu.dot_dimension_numbers<[1], [0], [0], [1], [0, 0, 1, 1], [], []>} : vector<2x32xbf16>, vector<32x256xbf16>, vector<2x256xf32> -> vector<2x256xf32>
    %205 = vector.broadcast %4 : vector<1x256xf32> to vector<2x256xf32>
    %206 = arith.addf %204, %205 : vector<2x256xf32>
    %207 = vector.extract_strided_slice %206 {offsets = [0, 128], sizes = [2, 4], strides = [1, 1]} : vector<2x256xf32> to vector<2x4xf32>
    %c1_i32_59 = arith.constant 1 : i32
    %208 = arith.subi %c1_i32_57, %c1_i32_59 : i32
    %209 = arith.index_cast %208 : i32 to index
    %c0_60 = arith.constant 0 : index
    %c0_61 = arith.constant 0 : index
    %210 = vector.load %arg11[%209, %c0_60, %c0_61] : memref<5x2x4xf32, #tpu.memory_space<vmem>>, vector<1x2x4xf32>
    %211 = vector.shape_cast %210 : vector<1x2x4xf32> to vector<2x4xf32>
    %212 = vector.shape_cast %207 : vector<2x4xf32> to vector<1x2x4xf32>
    tpu.vector_store %arg11[%209, %c0_60, %c0_61], %212 {strides = array<i32>} : memref<5x2x4xf32, #tpu.memory_space<vmem>>, vector<1x2x4xf32>,
    %213 = vector.extract_strided_slice %206 {offsets = [0, 0], sizes = [2, 128], strides = [1, 1]} : vector<2x256xf32> to vector<2x128xf32>
    %214 = arith.negf %213 : vector<2x128xf32>
    %215 = math.exp %214 : vector<2x128xf32>
    %cst_62 = arith.constant 1.000000e+00 : f32
    %216 = vector.broadcast %cst_62 : f32 to vector<2x128xf32>
    %217 = arith.addf %216, %215 : vector<2x128xf32>
    %218 = arith.divf %216, %217 : vector<2x128xf32>
    %219 = math.tanh %213 : vector<2x128xf32>
    %220 = vector.extract_strided_slice %218 {offsets = [0, 0], sizes = [2, 32], strides = [1, 1]} : vector<2x128xf32> to vector<2x32xf32>
    %221 = vector.extract_strided_slice %218 {offsets = [0, 32], sizes = [2, 32], strides = [1, 1]} : vector<2x128xf32> to vector<2x32xf32>
    %222 = vector.extract_strided_slice %219 {offsets = [0, 64], sizes = [2, 32], strides = [1, 1]} : vector<2x128xf32> to vector<2x32xf32>
    %223 = vector.extract_strided_slice %218 {offsets = [0, 96], sizes = [2, 32], strides = [1, 1]} : vector<2x128xf32> to vector<2x32xf32>
    %224 = arith.mulf %221, %200 : vector<2x32xf32>
    %225 = arith.mulf %220, %222 : vector<2x32xf32>
    %226 = arith.addf %224, %225 : vector<2x32xf32>
    %227 = math.tanh %226 : vector<2x32xf32>
    %228 = arith.mulf %223, %227 : vector<2x32xf32>
    %c2_i32_63 = arith.constant 2 : i32
    %229 = arith.truncf %228 : vector<2x32xf32> to vector<2x32xbf16>
    %cst_64 = arith.constant dense<0.000000e+00> : vector<2x256xf32>
    %230 = tpu.matmul %229, %3, %cst_64 {dimension_numbers = #tpu.dot_dimension_numbers<[1], [0], [0], [1], [0, 0, 1, 1], [], []>} : vector<2x32xbf16>, vector<32x256xbf16>, vector<2x256xf32> -> vector<2x256xf32>
    %231 = vector.broadcast %4 : vector<1x256xf32> to vector<2x256xf32>
    %232 = arith.addf %230, %231 : vector<2x256xf32>
    %233 = vector.extract_strided_slice %232 {offsets = [0, 128], sizes = [2, 4], strides = [1, 1]} : vector<2x256xf32> to vector<2x4xf32>
    %c1_i32_65 = arith.constant 1 : i32
    %234 = arith.subi %c2_i32_63, %c1_i32_65 : i32
    %235 = arith.index_cast %234 : i32 to index
    %c0_66 = arith.constant 0 : index
    %c0_67 = arith.constant 0 : index
    %236 = vector.load %arg11[%235, %c0_66, %c0_67] : memref<5x2x4xf32, #tpu.memory_space<vmem>>, vector<1x2x4xf32>
    %237 = vector.shape_cast %236 : vector<1x2x4xf32> to vector<2x4xf32>
    %238 = vector.shape_cast %233 : vector<2x4xf32> to vector<1x2x4xf32>
    tpu.vector_store %arg11[%235, %c0_66, %c0_67], %238 {strides = array<i32>} : memref<5x2x4xf32, #tpu.memory_space<vmem>>, vector<1x2x4xf32>,
    %239 = vector.extract_strided_slice %232 {offsets = [0, 0], sizes = [2, 128], strides = [1, 1]} : vector<2x256xf32> to vector<2x128xf32>
    %240 = arith.negf %239 : vector<2x128xf32>
    %241 = math.exp %240 : vector<2x128xf32>
    %cst_68 = arith.constant 1.000000e+00 : f32
    %242 = vector.broadcast %cst_68 : f32 to vector<2x128xf32>
    %243 = arith.addf %242, %241 : vector<2x128xf32>
    %244 = arith.divf %242, %243 : vector<2x128xf32>
    %245 = math.tanh %239 : vector<2x128xf32>
    %246 = vector.extract_strided_slice %244 {offsets = [0, 0], sizes = [2, 32], strides = [1, 1]} : vector<2x128xf32> to vector<2x32xf32>
    %247 = vector.extract_strided_slice %244 {offsets = [0, 32], sizes = [2, 32], strides = [1, 1]} : vector<2x128xf32> to vector<2x32xf32>
    %248 = vector.extract_strided_slice %245 {offsets = [0, 64], sizes = [2, 32], strides = [1, 1]} : vector<2x128xf32> to vector<2x32xf32>
    %249 = vector.extract_strided_slice %244 {offsets = [0, 96], sizes = [2, 32], strides = [1, 1]} : vector<2x128xf32> to vector<2x32xf32>
    %250 = arith.mulf %247, %226 : vector<2x32xf32>
    %251 = arith.mulf %246, %248 : vector<2x32xf32>
    %252 = arith.addf %250, %251 : vector<2x32xf32>
    %253 = math.tanh %252 : vector<2x32xf32>
    %254 = arith.mulf %249, %253 : vector<2x32xf32>
    %c3_i32_69 = arith.constant 3 : i32
    %255 = arith.truncf %254 : vector<2x32xf32> to vector<2x32xbf16>
    %cst_70 = arith.constant dense<0.000000e+00> : vector<2x256xf32>
    %256 = tpu.matmul %255, %3, %cst_70 {dimension_numbers = #tpu.dot_dimension_numbers<[1], [0], [0], [1], [0, 0, 1, 1], [], []>} : vector<2x32xbf16>, vector<32x256xbf16>, vector<2x256xf32> -> vector<2x256xf32>
    %257 = vector.broadcast %4 : vector<1x256xf32> to vector<2x256xf32>
    %258 = arith.addf %256, %257 : vector<2x256xf32>
    %259 = vector.extract_strided_slice %258 {offsets = [0, 128], sizes = [2, 4], strides = [1, 1]} : vector<2x256xf32> to vector<2x4xf32>
    %c1_i32_71 = arith.constant 1 : i32
    %260 = arith.subi %c3_i32_69, %c1_i32_71 : i32
    %261 = arith.index_cast %260 : i32 to index
    %c0_72 = arith.constant 0 : index
    %c0_73 = arith.constant 0 : index
    %262 = vector.load %arg11[%261, %c0_72, %c0_73] : memref<5x2x4xf32, #tpu.memory_space<vmem>>, vector<1x2x4xf32>
    %263 = vector.shape_cast %262 : vector<1x2x4xf32> to vector<2x4xf32>
    %264 = vector.shape_cast %259 : vector<2x4xf32> to vector<1x2x4xf32>
    tpu.vector_store %arg11[%261, %c0_72, %c0_73], %264 {strides = array<i32>} : memref<5x2x4xf32, #tpu.memory_space<vmem>>, vector<1x2x4xf32>,
    %265 = vector.extract_strided_slice %258 {offsets = [0, 0], sizes = [2, 128], strides = [1, 1]} : vector<2x256xf32> to vector<2x128xf32>
    %266 = arith.negf %265 : vector<2x128xf32>
    %267 = math.exp %266 : vector<2x128xf32>
    %cst_74 = arith.constant 1.000000e+00 : f32
    %268 = vector.broadcast %cst_74 : f32 to vector<2x128xf32>
    %269 = arith.addf %268, %267 : vector<2x128xf32>
    %270 = arith.divf %268, %269 : vector<2x128xf32>
    %271 = math.tanh %265 : vector<2x128xf32>
    %272 = vector.extract_strided_slice %270 {offsets = [0, 0], sizes = [2, 32], strides = [1, 1]} : vector<2x128xf32> to vector<2x32xf32>
    %273 = vector.extract_strided_slice %270 {offsets = [0, 32], sizes = [2, 32], strides = [1, 1]} : vector<2x128xf32> to vector<2x32xf32>
    %274 = vector.extract_strided_slice %271 {offsets = [0, 64], sizes = [2, 32], strides = [1, 1]} : vector<2x128xf32> to vector<2x32xf32>
    %275 = vector.extract_strided_slice %270 {offsets = [0, 96], sizes = [2, 32], strides = [1, 1]} : vector<2x128xf32> to vector<2x32xf32>
    %276 = arith.mulf %273, %252 : vector<2x32xf32>
    %277 = arith.mulf %272, %274 : vector<2x32xf32>
    %278 = arith.addf %276, %277 : vector<2x32xf32>
    %279 = math.tanh %278 : vector<2x32xf32>
    %280 = arith.mulf %275, %279 : vector<2x32xf32>
    %c4_i32_75 = arith.constant 4 : i32
    %281 = arith.truncf %280 : vector<2x32xf32> to vector<2x32xbf16>
    %cst_76 = arith.constant dense<0.000000e+00> : vector<2x256xf32>
    %282 = tpu.matmul %281, %3, %cst_76 {dimension_numbers = #tpu.dot_dimension_numbers<[1], [0], [0], [1], [0, 0, 1, 1], [], []>} : vector<2x32xbf16>, vector<32x256xbf16>, vector<2x256xf32> -> vector<2x256xf32>
    %283 = vector.broadcast %4 : vector<1x256xf32> to vector<2x256xf32>
    %284 = arith.addf %282, %283 : vector<2x256xf32>
    %285 = vector.extract_strided_slice %284 {offsets = [0, 128], sizes = [2, 4], strides = [1, 1]} : vector<2x256xf32> to vector<2x4xf32>
    %c1_i32_77 = arith.constant 1 : i32
    %286 = arith.subi %c4_i32_75, %c1_i32_77 : i32
    %287 = arith.index_cast %286 : i32 to index
    %c0_78 = arith.constant 0 : index
    %c0_79 = arith.constant 0 : index
    %288 = vector.load %arg11[%287, %c0_78, %c0_79] : memref<5x2x4xf32, #tpu.memory_space<vmem>>, vector<1x2x4xf32>
    %289 = vector.shape_cast %288 : vector<1x2x4xf32> to vector<2x4xf32>
    %290 = vector.shape_cast %285 : vector<2x4xf32> to vector<1x2x4xf32>
    tpu.vector_store %arg11[%287, %c0_78, %c0_79], %290 {strides = array<i32>} : memref<5x2x4xf32, #tpu.memory_space<vmem>>, vector<1x2x4xf32>,
    %291 = vector.extract_strided_slice %284 {offsets = [0, 0], sizes = [2, 128], strides = [1, 1]} : vector<2x256xf32> to vector<2x128xf32>
    %292 = arith.negf %291 : vector<2x128xf32>
    %293 = math.exp %292 : vector<2x128xf32>
    %cst_80 = arith.constant 1.000000e+00 : f32
    %294 = vector.broadcast %cst_80 : f32 to vector<2x128xf32>
    %295 = arith.addf %294, %293 : vector<2x128xf32>
    %296 = arith.divf %294, %295 : vector<2x128xf32>
    %297 = math.tanh %291 : vector<2x128xf32>
    %298 = vector.extract_strided_slice %296 {offsets = [0, 0], sizes = [2, 32], strides = [1, 1]} : vector<2x128xf32> to vector<2x32xf32>
    %299 = vector.extract_strided_slice %296 {offsets = [0, 32], sizes = [2, 32], strides = [1, 1]} : vector<2x128xf32> to vector<2x32xf32>
    %300 = vector.extract_strided_slice %297 {offsets = [0, 64], sizes = [2, 32], strides = [1, 1]} : vector<2x128xf32> to vector<2x32xf32>
    %301 = vector.extract_strided_slice %296 {offsets = [0, 96], sizes = [2, 32], strides = [1, 1]} : vector<2x128xf32> to vector<2x32xf32>
    %302 = arith.mulf %299, %278 : vector<2x32xf32>
    %303 = arith.mulf %298, %300 : vector<2x32xf32>
    %304 = arith.addf %302, %303 : vector<2x32xf32>
    %305 = math.tanh %304 : vector<2x32xf32>
    %306 = arith.mulf %301, %305 : vector<2x32xf32>
    %c4_i32_81 = arith.constant 4 : i32
    %307 = arith.truncf %306 : vector<2x32xf32> to vector<2x32xbf16>
    %cst_82 = arith.constant dense<0.000000e+00> : vector<2x4xf32>
    %308 = tpu.matmul %307, %5, %cst_82 {dimension_numbers = #tpu.dot_dimension_numbers<[1], [0], [0], [1], [0, 0, 1, 1], [], []>} : vector<2x32xbf16>, vector<32x4xbf16>, vector<2x4xf32> -> vector<2x4xf32>
    %309 = vector.broadcast %6 : vector<1x4xf32> to vector<2x4xf32>
    %310 = arith.addf %308, %309 : vector<2x4xf32>
    %c4 = arith.constant 4 : index
    %c0_83 = arith.constant 0 : index
    %c0_84 = arith.constant 0 : index
    %311 = vector.load %arg11[%c4, %c0_83, %c0_84] : memref<5x2x4xf32, #tpu.memory_space<vmem>>, vector<1x2x4xf32>
    %312 = vector.shape_cast %311 : vector<1x2x4xf32> to vector<2x4xf32>
    %313 = vector.shape_cast %310 : vector<2x4xf32> to vector<1x2x4xf32>
    tpu.vector_store %arg11[%c4, %c0_83, %c0_84], %313 {strides = array<i32>} : memref<5x2x4xf32, #tpu.memory_space<vmem>>, vector<1x2x4xf32>,
    return
  }
  func.func @transform_0(%arg0: i32) -> (i32, i32) {
    %c0_i32 = arith.constant 0 : i32
    %c0_i32_0 = arith.constant 0 : i32
    %c0_i32_1 = arith.constant 0 : i32
    return %c0_i32, %c0_i32_0 : i32, i32
  }
  func.func @transform_1(%arg0: i32) -> (i32, i32) {
    %c0_i32 = arith.constant 0 : i32
    %c0_i32_0 = arith.constant 0 : i32
    %c0_i32_1 = arith.constant 0 : i32
    return %c0_i32, %c0_i32_0 : i32, i32
  }
  func.func @transform_2(%arg0: i32) -> (i32, i32) {
    %c0_i32 = arith.constant 0 : i32
    %c0_i32_0 = arith.constant 0 : i32
    %c0_i32_1 = arith.constant 0 : i32
    return %c0_i32, %c0_i32_0 : i32, i32
  }
  func.func @transform_3(%arg0: i32) -> (i32, i32) {
    %c0_i32 = arith.constant 0 : i32
    %c0_i32_0 = arith.constant 0 : i32
    %c0_i32_1 = arith.constant 0 : i32
    return %c0_i32, %c0_i32_0 : i32, i32
  }
  func.func @transform_4(%arg0: i32) -> (i32, i32) {
    %c0_i32 = arith.constant 0 : i32
    %c0_i32_0 = arith.constant 0 : i32
    %c0_i32_1 = arith.constant 0 : i32
    return %c0_i32, %c0_i32_0 : i32, i32
  }
  func.func @transform_5(%arg0: i32) -> (i32, i32) {
    %c0_i32 = arith.constant 0 : i32
    %c0_i32_0 = arith.constant 0 : i32
    %c0_i32_1 = arith.constant 0 : i32
    return %c0_i32, %c0_i32_0 : i32, i32
  }
  func.func @transform_6(%arg0: i32) -> (i32, i32) {
    %c0_i32 = arith.constant 0 : i32
    %c0_i32_0 = arith.constant 0 : i32
    %c0_i32_1 = arith.constant 0 : i32
    return %c0_i32, %c0_i32_0 : i32, i32
  }
  func.func @transform_7(%arg0: i32) -> (i32, i32) {
    %c0_i32 = arith.constant 0 : i32
    %c0_i32_0 = arith.constant 0 : i32
    %c0_i32_1 = arith.constant 0 : i32
    return %c0_i32, %c0_i32_0 : i32, i32
  }
  func.func @transform_8(%arg0: i32) -> (i32, i32) {
    %c0_i32 = arith.constant 0 : i32
    %c0_i32_0 = arith.constant 0 : i32
    %c0_i32_1 = arith.constant 0 : i32
    return %c0_i32, %c0_i32_0 : i32, i32
  }
  func.func @transform_9(%arg0: i32) -> (i32, i32) {
    %c0_i32 = arith.constant 0 : i32
    %c0_i32_0 = arith.constant 0 : i32
    %c0_i32_1 = arith.constant 0 : i32
    return %c0_i32, %c0_i32_0 : i32, i32
  }
  func.func @transform_10(%arg0: i32) -> (i32, i32, i32) {
    %c0_i32 = arith.constant 0 : i32
    %c0_i32_0 = arith.constant 0 : i32
    %c0_i32_1 = arith.constant 0 : i32
    %c0_i32_2 = arith.constant 0 : i32
    return %c0_i32, %c0_i32_0, %c0_i32_1 : i32, i32, i32
  }
}

</mosaic_0001>

<bundles_post_ra>
// kernel: forecasting_forward.1
= control target key start
LH: loop header
LB: loop body
LE: loop exit
PB: predicated region body
PF: predicated region fallthrough
CT: control target
= control target key end

     0   :  { %15 = vsyncpa [#allocation4], 0  ;;  %s1959_s0 = inlined_call_operand.vmem [shape: bf16[16,4], index: 0, kind: input, shape index: {}]   ;;  %s1960_s1 = inlined_call_operand.vmem [shape: bf16[4,128], index: 1, kind: input, shape index: {}]   ;;  %s1961_s2 = inlined_call_operand.vmem [shape: bf16[32,128], index: 2, kind: input, shape index: {}]   ;;  %s1962_s3 = inlined_call_operand.hbm [shape: f32[1,128], index: 3, kind: input, shape index: {}]   ;;  %s1963_s4 = inlined_call_operand.vmem [shape: bf16[32,128], index: 4, kind: input, shape index: {}]   ;;  %s1964_s5 = inlined_call_operand.hbm [shape: f32[1,128], index: 5, kind: input, shape index: {}]   ;;  %s1965_s6 = inlined_call_operand.vmem [shape: bf16[32,256], index: 6, kind: input, shape index: {}]   ;;  %s1966_s7 = inlined_call_operand.hbm [shape: f32[1,256], index: 7, kind: input, shape index: {}]   ;;  %s1967_s8 = inlined_call_operand.vmem [shape: bf16[32,4], index: 8, kind: input, shape index: {}]   ;;  %s1968_s9 = inlined_call_operand.hbm [shape: f32[1,4], index: 9, kind: input, shape index: {}]   ;;  %s1969_s10 = inlined_call_operand.vmem [shape: f32[5,2,4], index: 10, kind: output, shape index: {}]  }
   0x1   :  { %16 = vsyncpa [#allocation6], 0 }
   0x2   :  { %17 = vsyncpa [#allocation9], 0  ;;  %s1634_s13 = smov [#allocation5]   ;;  %s1635_s15 = smov [#allocation3]  }
   0x3   :  { %s42_s14 = sshll.u32 %s1634_s13, 4  ;;  %s30_s16 = sshll.u32 %s1635_s15, 4  ;;  %s43_s14 = int_to_ptr.vmem [resolvable:$true] %s42_s14  ;;  %s31_s16 = int_to_ptr.vmem [resolvable:$true] %s30_s16 }
   0x4   :  { %s1540_s19 = scalar_lea.hbm %s1964_s5, 16 }
   0x5   :  { %p1541_p0 = scmp.ne.s32.totalorder %s1964_s5, %s1540_s19  ;;  %p1544_p1 = scmp.lt.u32.totalorder %s1540_s19, %s1964_s5 }
   0x7   :  { %p1546_p2 = pnand %p1544_p1, %p1541_p0 }
   0x9   :  { %1549 = shalt.err (!%p1546_p2)
}
   0xa   :  { %s1550_s24 = scalar_lea.vmem %s43_s14, 16  ;;  %s1554_s25 = scalar_lea.vmem %s43_s14, 32 }
   0xb   :  { %p1551_p3 = scmp.ne.s32.totalorder %s43_s14, %s1550_s24  ;;  %p1555_p4 = scmp.lt.s32.totalorder %s43_s14, %s43_s14 }
   0xc   :  { %p1556_p5 = scmp.lt.s32.totalorder %s1554_s25, %s1550_s24 }
   0xe   :  { %p1557_p6 = por %p1556_p5, %p1555_p4 }
  0x10   :  { %p1558_p7 = pnand %p1557_p6, %p1551_p3 }
  0x12   :  { %1561 = shalt.err (!%p1558_p7)
}
  0x13   :  { %45 = dma.hbm_to_vmem [thread:$0]  %s1964_s5, 16, %s43_s14, [#allocation6]  }
  0x14   :  { %s1562_s30 = scalar_lea.hbm %s1962_s3, 16 }
  0x15   :  { %p1563_p8 = scmp.ne.s32.totalorder %s1962_s3, %s1562_s30  ;;  %p1566_p9 = scmp.lt.u32.totalorder %s1562_s30, %s1962_s3 }
  0x17   :  { %p1568_p10 = pnand %p1566_p9, %p1563_p8 }
  0x19   :  { %1571 = shalt.err (!%p1568_p10)
}
  0x1a   :  { %s1572_s17 = scalar_lea.vmem %s31_s16, 16  ;;  %s1576_s18 = scalar_lea.vmem %s31_s16, 32 }
  0x1b   :  { %p1573_p11 = scmp.ne.s32.totalorder %s31_s16, %s1572_s17  ;;  %p1577_p12 = scmp.lt.s32.totalorder %s31_s16, %s31_s16 }
  0x1c   :  { %p1578_p13 = scmp.lt.s32.totalorder %s1576_s18, %s1572_s17 }
  0x1e   :  { %p1579_p0 = por %p1578_p13, %p1577_p12 }
  0x20   :  { %p1580_p1 = pnand %p1579_p0, %p1573_p11 }
  0x22   :  { %1583 = shalt.err (!%p1580_p1)
}
  0x23   :  { %33 = dma.hbm_to_vmem [thread:$0]  %s1962_s3, 16, %s31_s16, [#allocation4]  }
  0x24   :  { %s1636_s19 = smov [#allocation7]   ;;  %s1637_s21 = smov [#allocation8]  }
  0x25   :  { %s54_s20 = sshll.u32 %s1636_s19, 4  ;;  %s66_s22 = sshll.u32 %s1637_s21, 4  ;;  %s55_s20 = int_to_ptr.vmem [resolvable:$true] %s54_s20  ;;  %s67_s22 = int_to_ptr.vmem [resolvable:$true] %s66_s22 }
  0x26   :  { %s1584_s25 = scalar_lea.hbm %s1966_s7, 32 }
  0x27   :  { %p1585_p2 = scmp.ne.s32.totalorder %s1966_s7, %s1584_s25  ;;  %p1588_p3 = scmp.lt.u32.totalorder %s1584_s25, %s1966_s7 }
  0x29   :  { %p1590_p4 = pnand %p1588_p3, %p1585_p2 }
  0x2b   :  { %1593 = shalt.err (!%p1590_p4)
}
  0x2c   :  { %s1594_s3 = scalar_lea.vmem %s55_s20, 32  ;;  %p1599_p6 = scmp.lt.s32.totalorder %s55_s20, %s55_s20 }
  0x2d   :  { %p1595_p5 = scmp.ne.s32.totalorder %s55_s20, %s1594_s3  ;;  %p1600_p7 = scmp.lt.s32.totalorder %s1594_s3, %s1594_s3 }
  0x2f   :  { %p1601_p8 = por %p1600_p7, %p1599_p6 }
  0x31   :  { %p1602_p9 = pnand %p1601_p8, %p1595_p5 }
  0x33   :  { %1605 = shalt.err (!%p1602_p9)
}
  0x34   :  { %57 = dma.hbm_to_vmem [thread:$0]  %s1966_s7, 32, %s55_s20, [#allocation6]  }
  0x35   :  { %s1606_s13 = scalar_lea.hbm %s1968_s9, 16 }
  0x36   :  { %p1607_p10 = scmp.ne.s32.totalorder %s1968_s9, %s1606_s13  ;;  %p1610_p11 = scmp.lt.u32.totalorder %s1606_s13, %s1968_s9 }
  0x38   :  { %p1612_p12 = pnand %p1610_p11, %p1607_p10 }
  0x3a   :  { %1615 = shalt.err (!%p1612_p12)
}
  0x3b   :  { %s1616_s14 = scalar_lea.vmem %s67_s22, 16  ;;  %s1620_s19 = scalar_lea.vmem %s67_s22, 32 }
  0x3c   :  { %p1617_p13 = scmp.ne.s32.totalorder %s67_s22, %s1616_s14  ;;  %p1621_p0 = scmp.lt.s32.totalorder %s67_s22, %s67_s22 }
  0x3d   :  { %p1622_p1 = scmp.lt.s32.totalorder %s1620_s19, %s1616_s14 }
  0x3f   :  { %p1623_p2 = por %p1622_p1, %p1621_p0 }
  0x41   :  { %p1624_p3 = pnand %p1623_p2, %p1617_p13 }
  0x43   :  { %1627 = shalt.err (!%p1624_p3)
}
  0x44   :  { %69 = dma.hbm_to_vmem [thread:$0]  %s1968_s9, 16, %s67_s22, [#allocation9]  }
  0x45   :  { %1628 = dma.done.wait [#allocation4], 16  }
  0x46   :  { %1629 = vsyncadd [#allocation4], 4294967280 }
  0x47   :  { %1630 = dma.done.wait [#allocation6], 48  }
  0x48   :  { %1631 = vsyncadd [#allocation6], 4294967248 }
  0x49   :  { %1632 = dma.done.wait [#allocation9], 16  }
  0x4a   :  { %1633 = vsyncadd [#allocation9], 4294967280  ;;  %v1638_v0 = vmov 0.0   ;;  %vm1639_vm0 = vmmov 0   ;;  %vm121_vm1 = vcmask 1041408   ;;  %v1423_v3 = vld [vmem:[%s1959_s0] sm:$0xff]  }
  0x4b   :  { %1328 = vmatprep.subr.bf16.mxu0 %v1638_v0  ;;  %1330 = vmatprep.mubr.msk.bf16.mxu0 %vm1639_vm0, %v1638_v0  ;;  %v104_v1 = vld [vmem:[%s1960_s1] sm:$0x3]  ;;  %vm117_vm2 = vcmask 31744   ;;  %v1766_v5 = vld [vmem:[%s1961_s2 + $0x8] sm:$0xff]   ;;  %v1640_v6 = vmov 0   ;;  %s1641_s0 = smov 64  }
  0x4c   :  { %1334 = vmatprep.subr.bf16.mxu1 %v1638_v0  ;;  %1338 = vmatprep.mubr.msk.bf16.mxu1 %vm1639_vm0, %v1638_v0  ;;  %v123_v2 = vsel %vm121_vm1, %v104_v1, 0  ;;  %v1761_v4 = vld [vmem:[%s1961_s2] sm:$0xff]   ;;  %v1251_v7 = vld [vmem:[#allocation3] ss:$0 sm:$0xff]  ;;  %s1642_s1 = smov 32   ;;  %vm181_vm3 = vcmask 261120  }
  0x4d   :  { %1329 = vmatpush3.bf16.msra.mxu0 %v123_v2  ;;  %1335 = vmatpush3.bf16.msra.mxu1 %v1761_v4  ;;  %vm929_vm4 = vcmask 25600  }
  0x4e   :  { %1342 = vmatprep.subr.bf16.mxu0 %v1638_v0  ;;  %1336 = vmatprep.subr.bf16.mxu1 %v1638_v0 }
  0x50   :  { %1331 = vmatmul.mubr.msk.bf16.vlgmr.msra.gmra.mrb[0].mxu0 %vm117_vm2, %v1423_v3 }
  0x51   :  { %1343 = vmatpush3.bf16.msra.mxu0 %v1761_v4  ;;  %1346 = vmatprep.mubr.msk.bf16.mxu0 %vm1639_vm0, %v1638_v0 }
  0x52   :  { %1344 = vmatprep.subr.bf16.mxu0 %v1638_v0  ;;  %1337 = vmatpush3.bf16.msra.mxu1 %v1766_v5 }
  0x53   :  { %1350 = vmatprep.subr.bf16.mxu1 %v1638_v0 }
  0x55   :  { %1345 = vmatpush3.bf16.msra.mxu0 %v1766_v5  ;;  %1339 = vmatmul.mubr.bf16.vlgmr.msra.gmra.mrb[0].mxu1 %v1640_v6 }
  0x56   :  { %1358 = vmatprep.subr.bf16.mxu0 %v1638_v0  ;;  %1351 = vmatpush3.bf16.msra.mxu1 %v1761_v4 }
  0x57   :  { %1354 = vmatprep.mubr.msk.bf16.mxu1 %vm1639_vm0, %v1638_v0  ;;  %1352 = vmatprep.subr.bf16.mxu1 %v1638_v0 }
  0x5a   :  { %1353 = vmatpush3.bf16.msra.mxu1 %v1766_v5 }
  0x5b   :  { %1366 = vmatprep.subr.bf16.mxu1 %v1638_v0 }
 0x123   :  { %v159_v8 = vpop.f32.mrb[0].mxu0 }
 0x124   :  { %v160_v9 = vadd.f32 %v1251_v7, %v159_v8  ;;  %v1332_v10 = vpop.f32.mrb[1].mxu0 }
 0x125   :  { %v162_v11 = vpop.f32.mrb[2].mxu0 }
 0x126   :  { %166 = vst [vmem:[#allocation2] sm:$0xff] %v160_v9  ;;  %v163_v12 = vadd.f32 %v1251_v7, %v162_v11  ;;  %v1333_v13 = vpop.f32.mrb[3].mxu0 }
 0x128   :  { %167 = vst [vmem:[#allocation2 + $0x8] sm:$0xff] %v163_v12  ;;  %v219_v14 = vpop.f32.mrb[0].mxu1 }
 0x129   :  { %v1340_v15 = vpop.f32.mrb[1].mxu1 }
 0x12a   :  { %v222_v16 = vpop.f32.mrb[2].mxu1 }
 0x12b   :  { %v1341_v17 = vpop.f32.mrb[3].mxu1 }
 0x12d   :  { %v168_v18 = vld [vmem:[#allocation2] sm:$0x3]  ;;  %v250_v35 = vld [vmem:[#allocation2 + $0x2] sm:$0x3]  ;;  %v323_v56 = vld [vmem:[#allocation2 + $0x4] sm:$0x3] }
 0x12e   :  { %v225_v19 = vadd.f32 %v219_v14, %v168_v18  ;;  %v396_v17 = vld [vmem:[#allocation2 + $0x6] sm:$0x3] }
 0x130   :  { %1436 = vtanh.f32 %v225_v19  ;;  %v1256_v21 = vmul.f32 -1.442695, %v225_v19 }
 0x132   :  { %1438 = vpow2.f32 %v1256_v21 }
 0x13a   :  { %v1437_v20 = vpop.eup %1436 }
 0x13b   :  { %235 = vrot.lane.b32.xlu0 %v1437_v20, %s1641_s0 }
 0x13c   :  { %v1439_v22 = vpop.eup %1438 }
 0x13d   :  { %v229_v23 = vadd.f32 1.0, %v1439_v22 }
 0x13f   :  { %1440 = vrcp.f32 %v229_v23 }
 0x149   :  { %v1441_v24 = vpop.eup %1440 }
 0x14a   :  { %v233_v27 = vmul.f32 0.0, %v1441_v24 }
 0x1ad   :  { %v236_v25 = vpop.permute.xlu0 %235 }
 0x1ae   :  { %v238_v26 = vmul.f32 %v1441_v24, %v236_v25 }
 0x1b0   :  { %240 = vrot.lane.b32.xlu0 %v238_v26, %s1642_s1 }
 0x222   :  { %v241_v28 = vpop.permute.xlu0 %240 }
 0x223   :  { %v243_v29 = vadd.f32 %v241_v28, %v233_v27 }
 0x225   :  { %1442 = vtanh.f32 %v243_v29 }
 0x22f   :  { %v1443_v30 = vpop.eup %1442 }
 0x230   :  { %246 = vrot.lane.b32.xlu1 %v1443_v30, %s1641_s0 }
 0x2a2   :  { %v247_v31 = vpop.permute.xlu1 %246 }
 0x2a3   :  { %v249_v32 = vmul.f32 %v1441_v24, %v247_v31 }
 0x2a5   :  { %v251_v33 = vpack.c.bf16 %v249_v32, %v249_v32 }
 0x2a7   :  { %253 = vrot.lane.b32.xlu1 %v251_v33, %s1642_s1 }
 0x319   :  { %v254_v34 = vpop.permute.xlu1 %253 }
 0x31a   :  { %1347 = vmatmul.mubr.msk.bf16.vlgmr.msra.gmra.mrb[4].mxu0 %vm181_vm3, %v254_v34 }
 0x31b   :  { %1359 = vmatpush3.bf16.msra.mxu0 %v1761_v4  ;;  %1362 = vmatprep.mubr.msk.bf16.mxu0 %vm1639_vm0, %v1638_v0 }
 0x31c   :  { %1360 = vmatprep.subr.bf16.mxu0 %v1638_v0 }
 0x31f   :  { %1361 = vmatpush3.bf16.msra.mxu0 %v1766_v5 }
 0x320   :  { %1374 = vmatprep.subr.bf16.mxu0 %v1638_v0 }
 0x3ed   :  { %v292_v36 = vpop.f32.mrb[4].mxu0 }
 0x3ee   :  { %v298_v37 = vadd.f32 %v292_v36, %v250_v35  ;;  %v1348_v38 = vpop.f32.mrb[5].mxu0 }
 0x3ef   :  { %v295_v39 = vpop.f32.mrb[6].mxu0  ;;  %v469_v38 = vld [vmem:[#allocation2 + $0x8] sm:$0x3] }
 0x3f0   :  { %1444 = vtanh.f32 %v298_v37  ;;  %v1349_v40 = vpop.f32.mrb[7].mxu0  ;;  %v1258_v42 = vmul.f32 -1.442695, %v298_v37 }
 0x3f2   :  { %1446 = vpow2.f32 %v1258_v42 }
 0x3fa   :  { %v1445_v41 = vpop.eup %1444 }
 0x3fb   :  { %308 = vrot.lane.b32.xlu0 %v1445_v41, %s1641_s0 }
 0x3fc   :  { %v1447_v43 = vpop.eup %1446 }
 0x3fd   :  { %v302_v44 = vadd.f32 1.0, %v1447_v43 }
 0x3ff   :  { %1448 = vrcp.f32 %v302_v44 }
 0x409   :  { %v1449_v45 = vpop.eup %1448 }
 0x40a   :  { %v306_v48 = vmul.f32 %v1449_v45, %v243_v29 }
 0x46d   :  { %v309_v46 = vpop.permute.xlu0 %308 }
 0x46e   :  { %v311_v47 = vmul.f32 %v1449_v45, %v309_v46 }
 0x470   :  { %313 = vrot.lane.b32.xlu1 %v311_v47, %s1642_s1 }
 0x4e2   :  { %v314_v49 = vpop.permute.xlu1 %313 }
 0x4e3   :  { %v316_v50 = vadd.f32 %v314_v49, %v306_v48 }
 0x4e5   :  { %1450 = vtanh.f32 %v316_v50 }
 0x4ef   :  { %v1451_v51 = vpop.eup %1450 }
 0x4f0   :  { %319 = vrot.lane.b32.xlu0 %v1451_v51, %s1641_s0 }
 0x562   :  { %v320_v52 = vpop.permute.xlu0 %319 }
 0x563   :  { %v322_v53 = vmul.f32 %v1449_v45, %v320_v52 }
 0x565   :  { %v324_v54 = vpack.c.bf16 %v322_v53, %v322_v53 }
 0x567   :  { %326 = vrot.lane.b32.xlu1 %v324_v54, %s1642_s1 }
 0x5d9   :  { %v327_v55 = vpop.permute.xlu1 %326 }
 0x5da   :  { %1355 = vmatmul.mubr.msk.bf16.vlgmr.msra.gmra.mrb[4].mxu1 %vm181_vm3, %v327_v55 }
 0x5db   :  { %1367 = vmatpush3.bf16.msra.mxu1 %v1761_v4  ;;  %1370 = vmatprep.mubr.msk.bf16.mxu1 %vm1639_vm0, %v1638_v0 }
 0x5dc   :  { %1368 = vmatprep.subr.bf16.mxu1 %v1638_v0 }
 0x5df   :  { %1369 = vmatpush3.bf16.msra.mxu1 %v1766_v5 }
 0x5e0   :  { %1382 = vmatprep.subr.bf16.mxu1 %v1638_v0 }
 0x6ad   :  { %v365_v57 = vpop.f32.mrb[4].mxu1 }
 0x6ae   :  { %v371_v58 = vadd.f32 %v365_v57, %v323_v56  ;;  %v1356_v59 = vpop.f32.mrb[5].mxu1 }
 0x6af   :  { %v368_v60 = vpop.f32.mrb[6].mxu1  ;;  %v542_v59 = vld [vmem:[#allocation2 + $0xa] sm:$0x3] }
 0x6b0   :  { %1452 = vtanh.f32 %v371_v58  ;;  %v1357_v61 = vpop.f32.mrb[7].mxu1  ;;  %v1260_v63 = vmul.f32 -1.442695, %v371_v58 }
 0x6b2   :  { %1454 = vpow2.f32 %v1260_v63 }
 0x6ba   :  { %v1453_v62 = vpop.eup %1452 }
 0x6bb   :  { %381 = vrot.lane.b32.xlu0 %v1453_v62, %s1641_s0 }
 0x6bc   :  { %v1455_v1 = vpop.eup %1454 }
 0x6bd   :  { %v375_v2 = vadd.f32 1.0, %v1455_v1 }
 0x6bf   :  { %1456 = vrcp.f32 %v375_v2 }
 0x6c9   :  { %v1457_v3 = vpop.eup %1456 }
 0x6ca   :  { %v379_v9 = vmul.f32 %v1457_v3, %v316_v50 }
 0x72d   :  { %v382_v7 = vpop.permute.xlu0 %381 }
 0x72e   :  { %v384_v8 = vmul.f32 %v1457_v3, %v382_v7 }
 0x730   :  { %386 = vrot.lane.b32.xlu1 %v384_v8, %s1642_s1 }
 0x7a2   :  { %v387_v10 = vpop.permute.xlu1 %386 }
 0x7a3   :  { %v389_v11 = vadd.f32 %v387_v10, %v379_v9 }
 0x7a5   :  { %1458 = vtanh.f32 %v389_v11 }
 0x7af   :  { %v1459_v12 = vpop.eup %1458 }
 0x7b0   :  { %392 = vrot.lane.b32.xlu0 %v1459_v12, %s1641_s0 }
 0x822   :  { %v393_v13 = vpop.permute.xlu0 %392 }
 0x823   :  { %v395_v14 = vmul.f32 %v1457_v3, %v393_v13 }
 0x825   :  { %v397_v15 = vpack.c.bf16 %v395_v14, %v395_v14 }
 0x827   :  { %399 = vrot.lane.b32.xlu1 %v397_v15, %s1642_s1 }
 0x899   :  { %v400_v16 = vpop.permute.xlu1 %399 }
 0x89a   :  { %1363 = vmatmul.mubr.msk.bf16.vlgmr.msra.gmra.mrb[8].mxu0 %vm181_vm3, %v400_v16 }
 0x89b   :  { %1375 = vmatpush3.bf16.msra.mxu0 %v1761_v4  ;;  %1378 = vmatprep.mubr.msk.bf16.mxu0 %vm1639_vm0, %v1638_v0 }
 0x89c   :  { %1376 = vmatprep.subr.bf16.mxu0 %v1638_v0 }
 0x89f   :  { %1377 = vmatpush3.bf16.msra.mxu0 %v1766_v5 }
 0x8a0   :  { %1390 = vmatprep.subr.bf16.mxu0 %v1638_v0 }
 0x96d   :  { %v438_v18 = vpop.f32.mrb[8].mxu0 }
 0x96e   :  { %v444_v19 = vadd.f32 %v438_v18, %v396_v17  ;;  %v1364_v20 = vpop.f32.mrb[9].mxu0  ;;  %v615_v18 = vld [vmem:[#allocation2 + $0xc] sm:$0x3] }
 0x96f   :  { %v441_v21 = vpop.f32.mrb[10].mxu0 }
 0x970   :  { %1460 = vtanh.f32 %v444_v19  ;;  %v1365_v22 = vpop.f32.mrb[11].mxu0  ;;  %v1262_v24 = vmul.f32 -1.442695, %v444_v19 }
 0x972   :  { %1462 = vpow2.f32 %v1262_v24 }
 0x97a   :  { %v1461_v23 = vpop.eup %1460 }
 0x97b   :  { %454 = vrot.lane.b32.xlu0 %v1461_v23, %s1641_s0 }
 0x97c   :  { %v1463_v25 = vpop.eup %1462 }
 0x97d   :  { %v448_v26 = vadd.f32 1.0, %v1463_v25 }
 0x97f   :  { %1464 = vrcp.f32 %v448_v26 }
 0x989   :  { %v1465_v27 = vpop.eup %1464 }
 0x98a   :  { %v452_v30 = vmul.f32 %v1465_v27, %v389_v11 }
 0x9ed   :  { %v455_v28 = vpop.permute.xlu0 %454 }
 0x9ee   :  { %v457_v29 = vmul.f32 %v1465_v27, %v455_v28 }
 0x9f0   :  { %459 = vrot.lane.b32.xlu1 %v457_v29, %s1642_s1 }
 0xa62   :  { %v460_v31 = vpop.permute.xlu1 %459 }
 0xa63   :  { %v462_v32 = vadd.f32 %v460_v31, %v452_v30 }
 0xa65   :  { %1466 = vtanh.f32 %v462_v32 }
 0xa6f   :  { %v1467_v33 = vpop.eup %1466 }
 0xa70   :  { %465 = vrot.lane.b32.xlu0 %v1467_v33, %s1641_s0 }
 0xae2   :  { %v466_v34 = vpop.permute.xlu0 %465 }
 0xae3   :  { %v468_v35 = vmul.f32 %v1465_v27, %v466_v34 }
 0xae5   :  { %v470_v36 = vpack.c.bf16 %v468_v35, %v468_v35 }
 0xae7   :  { %472 = vrot.lane.b32.xlu1 %v470_v36, %s1642_s1 }
 0xb59   :  { %v473_v37 = vpop.permute.xlu1 %472 }
 0xb5a   :  { %1371 = vmatmul.mubr.msk.bf16.vlgmr.msra.gmra.mrb[8].mxu1 %vm181_vm3, %v473_v37 }
 0xb5b   :  { %1383 = vmatpush3.bf16.msra.mxu1 %v1761_v4  ;;  %1386 = vmatprep.mubr.msk.bf16.mxu1 %vm1639_vm0, %v1638_v0 }
 0xb5c   :  { %1384 = vmatprep.subr.bf16.mxu1 %v1638_v0 }
 0xb5f   :  { %1385 = vmatpush3.bf16.msra.mxu1 %v1766_v5 }
 0xb60   :  { %1398 = vmatprep.subr.bf16.mxu1 %v1638_v0 }
 0xc2d   :  { %v511_v39 = vpop.f32.mrb[8].mxu1 }
 0xc2e   :  { %v517_v40 = vadd.f32 %v511_v39, %v469_v38  ;;  %v1372_v41 = vpop.f32.mrb[9].mxu1  ;;  %v688_v39 = vld [vmem:[#allocation2 + $0xe] sm:$0x3] }
 0xc2f   :  { %v514_v42 = vpop.f32.mrb[10].mxu1 }
 0xc30   :  { %1468 = vtanh.f32 %v517_v40  ;;  %v1373_v43 = vpop.f32.mrb[11].mxu1  ;;  %v1264_v45 = vmul.f32 -1.442695, %v517_v40 }
 0xc32   :  { %1470 = vpow2.f32 %v1264_v45 }
 0xc3a   :  { %v1469_v44 = vpop.eup %1468 }
 0xc3b   :  { %527 = vrot.lane.b32.xlu0 %v1469_v44, %s1641_s0 }
 0xc3c   :  { %v1471_v46 = vpop.eup %1470 }
 0xc3d   :  { %v521_v47 = vadd.f32 1.0, %v1471_v46 }
 0xc3f   :  { %1472 = vrcp.f32 %v521_v47 }
 0xc49   :  { %v1473_v48 = vpop.eup %1472 }
 0xc4a   :  { %v525_v51 = vmul.f32 %v1473_v48, %v462_v32 }
 0xcad   :  { %v528_v49 = vpop.permute.xlu0 %527 }
 0xcae   :  { %v530_v50 = vmul.f32 %v1473_v48, %v528_v49 }
 0xcb0   :  { %532 = vrot.lane.b32.xlu1 %v530_v50, %s1642_s1 }
 0xd22   :  { %v533_v52 = vpop.permute.xlu1 %532 }
 0xd23   :  { %v535_v53 = vadd.f32 %v533_v52, %v525_v51 }
 0xd25   :  { %1474 = vtanh.f32 %v535_v53 }
 0xd2f   :  { %v1475_v54 = vpop.eup %1474 }
 0xd30   :  { %538 = vrot.lane.b32.xlu0 %v1475_v54, %s1641_s0 }
 0xda2   :  { %v539_v55 = vpop.permute.xlu0 %538 }
 0xda3   :  { %v541_v56 = vmul.f32 %v1473_v48, %v539_v55  ;;  %v1426_v55 = vld [vmem:[%s1963_s4] sm:$0xff]  }
 0xda5   :  { %v543_v57 = vpack.c.bf16 %v541_v56, %v541_v56  ;;  %v1427_v56 = vld [vmem:[%s1963_s4 + $0x8] sm:$0xff]  }
 0xda7   :  { %545 = vrot.lane.b32.xlu1 %v543_v57, %s1642_s1 }
 0xe19   :  { %v546_v58 = vpop.permute.xlu1 %545 }
 0xe1a   :  { %1379 = vmatmul.mubr.msk.bf16.vlgmr.msra.gmra.mrb[12].mxu0 %vm181_vm3, %v546_v58 }
 0xe1b   :  { %1391 = vmatpush3.bf16.msra.mxu0 %v1761_v4  ;;  %1394 = vmatprep.mubr.msk.bf16.mxu0 %vm1639_vm0, %v1638_v0 }
 0xe1c   :  { %1392 = vmatprep.subr.bf16.mxu0 %v1638_v0 }
 0xe1f   :  { %1393 = vmatpush3.bf16.msra.mxu0 %v1766_v5 }
 0xeed   :  { %v584_v60 = vpop.f32.mrb[12].mxu0 }
 0xeee   :  { %v590_v61 = vadd.f32 %v584_v60, %v542_v59  ;;  %v1380_v62 = vpop.f32.mrb[13].mxu0 }
 0xeef   :  { %v587_v63 = vpop.f32.mrb[14].mxu0  ;;  %v1271_v62 = vld [vmem:[#allocation5] ss:$0 sm:$0xff] }
 0xef0   :  { %1476 = vtanh.f32 %v590_v61  ;;  %v1381_v1 = vpop.f32.mrb[15].mxu0  ;;  %v1266_v3 = vmul.f32 -1.442695, %v590_v61 }
 0xef2   :  { %1478 = vpow2.f32 %v1266_v3 }
 0xefa   :  { %v1477_v2 = vpop.eup %1476 }
 0xefb   :  { %600 = vrot.lane.b32.xlu0 %v1477_v2, %s1641_s0 }
 0xefc   :  { %v1479_v4 = vpop.eup %1478 }
 0xefd   :  { %v594_v7 = vadd.f32 1.0, %v1479_v4 }
 0xeff   :  { %1480 = vrcp.f32 %v594_v7 }
 0xf09   :  { %v1481_v8 = vpop.eup %1480 }
 0xf0a   :  { %v598_v5 = vmul.f32 %v1481_v8, %v535_v53 }
 0xf6d   :  { %v601_v9 = vpop.permute.xlu0 %600 }
 0xf6e   :  { %v603_v10 = vmul.f32 %v1481_v8, %v601_v9 }
 0xf70   :  { %605 = vrot.lane.b32.xlu1 %v603_v10, %s1642_s1 }
 0xfe2   :  { %v606_v11 = vpop.permute.xlu1 %605 }
 0xfe3   :  { %v608_v12 = vadd.f32 %v606_v11, %v598_v5 }
 0xfe5   :  { %1482 = vtanh.f32 %v608_v12 }
 0xfef   :  { %v1483_v13 = vpop.eup %1482 }
 0xff0   :  { %611 = vrot.lane.b32.xlu0 %v1483_v13, %s1641_s0 }
0x1062   :  { %v612_v14 = vpop.permute.xlu0 %611 }
0x1063   :  { %v614_v15 = vmul.f32 %v1481_v8, %v612_v14 }
0x1065   :  { %v616_v16 = vpack.c.bf16 %v614_v15, %v614_v15 }
0x1067   :  { %618 = vrot.lane.b32.xlu1 %v616_v16, %s1642_s1  ;;  %v1428_v16 = vld [vmem:[%s1965_s6 + $0x4] ss:$8 sps:$4 sm:$0xff]  }
0x1068   :  { %888 = vmatprep.subr.bf16.mxu0 %v1428_v16 }
0x10d9   :  { %v619_v17 = vpop.permute.xlu1 %618 }
0x10da   :  { %1387 = vmatmul.mubr.msk.bf16.vlgmr.msra.gmra.mrb[12].mxu1 %vm181_vm3, %v619_v17  ;;  %v1874_v17 = vld [vmem:[%s1965_s6] ss:$8 sps:$4 sm:$0xff]  }
0x10db   :  { %1402 = vmatprep.mubr.msk.bf16.mxu1 %vm1639_vm0, %v1638_v0  ;;  %1399 = vmatpush3.bf16.msra.mxu1 %v1426_v55 }
0x10dc   :  { %1400 = vmatprep.subr.bf16.mxu1 %v1638_v0 }
0x10df   :  { %1401 = vmatpush3.bf16.msra.mxu1 %v1427_v56 }
0x10e0   :  { %962 = vmatprep.subr.bf16.mxu1 %v1428_v16 }
0x11ad   :  { %v657_v19 = vpop.f32.mrb[12].mxu1 }
0x11ae   :  { %v663_v20 = vadd.f32 %v657_v19, %v615_v18  ;;  %v1388_v21 = vpop.f32.mrb[13].mxu1  ;;  %v1879_v18 = vld [vmem:[%s1965_s6 + $0x14] ss:$8 sps:$4 sm:$0xff]   ;;  %v1433_v19 = vld [vmem:[%s1965_s6 + $0x10] ss:$8 sps:$4 sm:$0xff]  }
0x11af   :  { %v660_v22 = vpop.f32.mrb[14].mxu1 }
0x11b0   :  { %1484 = vtanh.f32 %v663_v20  ;;  %v1389_v23 = vpop.f32.mrb[15].mxu1  ;;  %v1268_v25 = vmul.f32 -1.442695, %v663_v20 }
0x11b2   :  { %1486 = vpow2.f32 %v1268_v25  ;;  %v852_v25 = vlaneseq }
0x11ba   :  { %v1485_v24 = vpop.eup %1484 }
0x11bb   :  { %673 = vrot.lane.b32.xlu0 %v1485_v24, %s1641_s0 }
0x11bc   :  { %v1487_v26 = vpop.eup %1486 }
0x11bd   :  { %v667_v27 = vadd.f32 1.0, %v1487_v26  ;;  %v853_v26 = vshrl.u32 %v852_v25, 7 }
0x11bf   :  { %1488 = vrcp.f32 %v667_v27  ;;  %v854_v27 = vsub.s32 0, %v853_v26 }
0x11c9   :  { %v1489_v28 = vpop.eup %1488 }
0x11ca   :  { %v671_v31 = vmul.f32 %v1489_v28, %v608_v12 }
0x122d   :  { %v674_v29 = vpop.permute.xlu0 %673 }
0x122e   :  { %v676_v30 = vmul.f32 %v1489_v28, %v674_v29  ;;  %v858_v29 = vsub.s32 1, %v853_v26 }
0x1230   :  { %678 = vrot.lane.b32.xlu1 %v676_v30, %s1642_s1 }
0x12a2   :  { %v679_v32 = vpop.permute.xlu1 %678 }
0x12a3   :  { %v681_v33 = vadd.f32 %v679_v32, %v671_v31 }
0x12a5   :  { %1490 = vtanh.f32 %v681_v33 }
0x12af   :  { %v1491_v34 = vpop.eup %1490 }
0x12b0   :  { %684 = vrot.lane.b32.xlu0 %v1491_v34, %s1641_s0 }
0x1322   :  { %v685_v35 = vpop.permute.xlu0 %684 }
0x1323   :  { %v687_v36 = vmul.f32 %v1489_v28, %v685_v35  ;;  %v96_v28 = vld [vmem:[#allocation7] sm:$0x3] }
0x1324   :  { %v1895_v30 = vrot.slane %v96_v28, %v854_v27  ;;  %v1897_v31 = vrot.slane %v96_v28, %v858_v29 }
0x1325   :  { %v689_v37 = vpack.c.bf16 %v687_v36, %v687_v36 }
0x1327   :  { %691 = vrot.lane.b32.xlu1 %v689_v37, %s1642_s1 }
0x1399   :  { %v692_v38 = vpop.permute.xlu1 %691 }
0x139a   :  { %1395 = vmatmul.mubr.msk.bf16.vlgmr.msra.gmra.mrb[16].mxu0 %vm181_vm3, %v692_v38 }
0x139b   :  { %920 = vmatprep.mubr.bf16.mxu0 %v1640_v6  ;;  %889 = vmatpush1.bf16.msra.mxu0 %v1874_v17 }
0x139c   :  { %890 = vmatprep.subr.bf16.mxu0 %v1879_v18 }
0x139f   :  { %891 = vmatpush1.bf16.msra.mxu0 %v1433_v19 }
0x13a0   :  { %1036 = vmatprep.subr.bf16.mxu0 %v1428_v16 }
0x146d   :  { %v730_v40 = vpop.f32.mrb[16].mxu0 }
0x146e   :  { %v736_v41 = vadd.f32 %v730_v40, %v688_v39  ;;  %v1396_v42 = vpop.f32.mrb[17].mxu0 }
0x146f   :  { %v733_v43 = vpop.f32.mrb[18].mxu0 }
0x1470   :  { %1492 = vtanh.f32 %v736_v41  ;;  %v1397_v44 = vpop.f32.mrb[19].mxu0  ;;  %v1270_v46 = vmul.f32 -1.442695, %v736_v41 }
0x1472   :  { %1494 = vpow2.f32 %v1270_v46 }
0x147a   :  { %v1493_v45 = vpop.eup %1492 }
0x147b   :  { %746 = vrot.lane.b32.xlu0 %v1493_v45, %s1641_s0 }
0x147c   :  { %v1495_v47 = vpop.eup %1494 }
0x147d   :  { %v740_v48 = vadd.f32 1.0, %v1495_v47 }
0x147f   :  { %1496 = vrcp.f32 %v740_v48 }
0x1489   :  { %v1497_v49 = vpop.eup %1496 }
0x148a   :  { %v744_v52 = vmul.f32 %v1497_v49, %v681_v33 }
0x14ed   :  { %v747_v50 = vpop.permute.xlu0 %746 }
0x14ee   :  { %v749_v51 = vmul.f32 %v1497_v49, %v747_v50 }
0x14f0   :  { %751 = vrot.lane.b32.xlu1 %v749_v51, %s1642_s1 }
0x1562   :  { %v752_v53 = vpop.permute.xlu1 %751 }
0x1563   :  { %v754_v54 = vadd.f32 %v752_v53, %v744_v52 }
0x1565   :  { %1498 = vtanh.f32 %v754_v54 }
0x156f   :  { %v1499_v57 = vpop.eup %1498 }
0x1570   :  { %757 = vrot.lane.b32.xlu0 %v1499_v57, %s1641_s0 }
0x15e2   :  { %v758_v58 = vpop.permute.xlu0 %757 }
0x15e3   :  { %v760_v59 = vmul.f32 %v1497_v49, %v758_v58 }
0x15e5   :  { %v761_v60 = vpack.c.bf16 %v760_v59, %v760_v59 }
0x15e7   :  { %769 = vrot.lane.b32.xlu1 %v761_v60, %s1642_s1 }
0x1659   :  { %v770_v61 = vpop.permute.xlu1 %769 }
0x165a   :  { %1403 = vmatmul.mubr.msk.bf16.vlgmr.msra.gmra.mrb[16].mxu1 %vm181_vm3, %v770_v61 }
0x165b   :  { %994 = vmatprep.mubr.bf16.mxu1 %v1640_v6  ;;  %963 = vmatpush1.bf16.msra.mxu1 %v1874_v17 }
0x165c   :  { %964 = vmatprep.subr.bf16.mxu1 %v1879_v18 }
0x165f   :  { %965 = vmatpush1.bf16.msra.mxu1 %v1433_v19 }
0x1660   :  { %1110 = vmatprep.subr.bf16.mxu1 %v1428_v16 }
0x172d   :  { %v820_v63 = vpop.f32.mrb[16].mxu1 }
0x172e   :  { %v821_v1 = vadd.f32 %v1271_v62, %v820_v63  ;;  %v1404_v2 = vpop.f32.mrb[17].mxu1 }
0x172f   :  { %v823_v3 = vpop.f32.mrb[18].mxu1 }
0x1730   :  { %1500 = vtanh.f32 %v821_v1  ;;  %v1405_v4 = vpop.f32.mrb[19].mxu1  ;;  %v1275_v8 = vmul.f32 -1.442695, %v821_v1 }
0x1732   :  { %1502 = vpow2.f32 %v1275_v8 }
0x173a   :  { %v1501_v7 = vpop.eup %1500 }
0x173b   :  { %835 = vrot.lane.b32.xlu0 %v1501_v7, %s1641_s0 }
0x173c   :  { %v1503_v9 = vpop.eup %1502 }
0x173d   :  { %v829_v10 = vadd.f32 1.0, %v1503_v9 }
0x173f   :  { %1504 = vrcp.f32 %v829_v10 }
0x1749   :  { %v1505_v5 = vpop.eup %1504 }
0x174a   :  { %v833_v13 = vmul.f32 %v1505_v5, %v754_v54 }
0x17ad   :  { %v836_v11 = vpop.permute.xlu0 %835 }
0x17ae   :  { %v838_v12 = vmul.f32 %v1505_v5, %v836_v11 }
0x17b0   :  { %840 = vrot.lane.b32.xlu1 %v838_v12, %s1642_s1 }
0x1822   :  { %v841_v14 = vpop.permute.xlu1 %840 }
0x1823   :  { %v843_v15 = vadd.f32 %v841_v14, %v833_v13 }
0x1825   :  { %1506 = vtanh.f32 %v843_v15 }
0x182f   :  { %v1507_v20 = vpop.eup %1506 }
0x1830   :  { %846 = vrot.lane.b32.xlu0 %v1507_v20, %s1641_s0 }
0x18a2   :  { %v847_v21 = vpop.permute.xlu0 %846 }
0x18a3   :  { %v849_v22 = vmul.f32 %v1505_v5, %v847_v21 }
0x18a5   :  { %v850_v23 = vpack.c.bf16 %v849_v22, %v849_v22 }
0x18a7   :  { %863 = vrot.lane.b32.xlu1 %v850_v23, %s1642_s1 }
0x1919   :  { %v864_v24 = vpop.permute.xlu1 %863 }
0x191a   :  { %1280 = vmatmul.mubr.msk.bf16.vlgmr.msra.gmra.mrb[20].mxu0 %vm181_vm3, %v864_v24 }
0x191b   :  { %1037 = vmatpush1.bf16.msra.mxu0 %v1874_v17  ;;  %1068 = vmatprep.mubr.bf16.mxu0 %v1640_v6 }
0x191c   :  { %1038 = vmatprep.subr.bf16.mxu0 %v1879_v18 }
0x191f   :  { %1039 = vmatpush1.bf16.msra.mxu0 %v1433_v19 }
0x1920   :  { %1406 = vmatprep.subr.bf16.mxu0 %v1638_v0 }
0x19ed   :  { %v922_v32 = vpop.f32.mrb[20].mxu0 }
0x19ee   :  { %v923_v33 = vadd.f32 %v922_v32, %v1895_v30  ;;  %v924_v34 = vpop.f32.mrb[21].mxu0 }
0x19ef   :  { %v925_v35 = vadd.f32 %v924_v34, %v1897_v31  ;;  %v926_v36 = vpop.f32.mrb[22].mxu0 }
0x19f0   :  { %1508 = vtanh.f32 %v923_v33  ;;  %v927_v37 = vpop.f32.mrb[23].mxu0  ;;  %v1281_v39 = vmul.f32 -1.442695, %v923_v33 }
0x19f1   :  { %930 = vst.msk [vmem:[%s1969_s10] sm:$0x3] %vm929_vm4, %v925_v35 }
0x19f2   :  { %1510 = vpow2.f32 %v1281_v39 }
0x19fa   :  { %v1509_v38 = vpop.eup %1508 }
0x19fb   :  { %940 = vrot.lane.b32.xlu0 %v1509_v38, %s1641_s0 }
0x19fc   :  { %v1511_v40 = vpop.eup %1510 }
0x19fd   :  { %v934_v41 = vadd.f32 1.0, %v1511_v40 }
0x19ff   :  { %1512 = vrcp.f32 %v934_v41 }
0x1a09   :  { %v1513_v42 = vpop.eup %1512 }
0x1a0a   :  { %v938_v45 = vmul.f32 %v1513_v42, %v843_v15 }
0x1a6d   :  { %v941_v43 = vpop.permute.xlu0 %940 }
0x1a6e   :  { %v943_v44 = vmul.f32 %v1513_v42, %v941_v43 }
0x1a70   :  { %945 = vrot.lane.b32.xlu1 %v943_v44, %s1642_s1 }
0x1ae2   :  { %v946_v46 = vpop.permute.xlu1 %945 }
0x1ae3   :  { %v948_v47 = vadd.f32 %v946_v46, %v938_v45 }
0x1ae5   :  { %1514 = vtanh.f32 %v948_v47 }
0x1aef   :  { %v1515_v48 = vpop.eup %1514 }
0x1af0   :  { %951 = vrot.lane.b32.xlu0 %v1515_v48, %s1641_s0  ;;  %v1434_v48 = vld [vmem:[%s1967_s8] sm:$0xff]  }
0x1b62   :  { %v952_v49 = vpop.permute.xlu0 %951 }
0x1b63   :  { %v954_v50 = vmul.f32 %v1513_v42, %v952_v49  ;;  %v1435_v49 = vld [vmem:[%s1967_s8 + $0x8] sm:$0xff]  }
0x1b65   :  { %v955_v51 = vpack.c.bf16 %v954_v50, %v954_v50 }
0x1b67   :  { %957 = vrot.lane.b32.xlu1 %v955_v51, %s1642_s1 }
0x1bd9   :  { %v958_v52 = vpop.permute.xlu1 %957 }
0x1bda   :  { %1282 = vmatmul.mubr.msk.bf16.vlgmr.msra.gmra.mrb[20].mxu1 %vm181_vm3, %v958_v52 }
0x1bdb   :  { %1111 = vmatpush1.bf16.msra.mxu1 %v1874_v17  ;;  %1142 = vmatprep.mubr.bf16.mxu1 %v1640_v6 }
0x1bdc   :  { %1112 = vmatprep.subr.bf16.mxu1 %v1879_v18 }
0x1bdf   :  { %1113 = vmatpush1.bf16.msra.mxu1 %v1433_v19 }
0x1cad   :  { %v996_v53 = vpop.f32.mrb[20].mxu1 }
0x1cae   :  { %v997_v54 = vadd.f32 %v996_v53, %v1895_v30  ;;  %v998_v55 = vpop.f32.mrb[21].mxu1 }
0x1caf   :  { %v999_v56 = vadd.f32 %v998_v55, %v1897_v31  ;;  %v1000_v57 = vpop.f32.mrb[22].mxu1  ;;  %v1291_v55 = vld [vmem:[#allocation8] ss:$0 sm:$0xff] }
0x1cb0   :  { %1516 = vtanh.f32 %v997_v54  ;;  %v1001_v58 = vpop.f32.mrb[23].mxu1  ;;  %v1284_v6 = vmul.f32 -1.442695, %v997_v54 }
0x1cb1   :  { %1283 = vst.msk [vmem:[%s1969_s10 + $0x2] sm:$0x3] %vm929_vm4, %v999_v56 }
0x1cb2   :  { %1518 = vpow2.f32 %v1284_v6 }
0x1cba   :  { %v1517_v59 = vpop.eup %1516 }
0x1cbb   :  { %1014 = vrot.lane.b32.xlu0 %v1517_v59, %s1641_s0 }
0x1cbc   :  { %v1519_v60 = vpop.eup %1518 }
0x1cbd   :  { %v1008_v61 = vadd.f32 1.0, %v1519_v60 }
0x1cbf   :  { %1520 = vrcp.f32 %v1008_v61 }
0x1cc9   :  { %v1521_v62 = vpop.eup %1520 }
0x1cca   :  { %v1012_v2 = vmul.f32 %v1521_v62, %v948_v47 }
0x1d2d   :  { %v1015_v63 = vpop.permute.xlu0 %1014 }
0x1d2e   :  { %v1017_v1 = vmul.f32 %v1521_v62, %v1015_v63 }
0x1d30   :  { %1019 = vrot.lane.b32.xlu1 %v1017_v1, %s1642_s1 }
0x1da2   :  { %v1020_v3 = vpop.permute.xlu1 %1019 }
0x1da3   :  { %v1022_v4 = vadd.f32 %v1020_v3, %v1012_v2 }
0x1da5   :  { %1522 = vtanh.f32 %v1022_v4 }
0x1daf   :  { %v1523_v7 = vpop.eup %1522 }
0x1db0   :  { %1025 = vrot.lane.b32.xlu0 %v1523_v7, %s1641_s0 }
0x1e22   :  { %v1026_v8 = vpop.permute.xlu0 %1025 }
0x1e23   :  { %v1028_v9 = vmul.f32 %v1521_v62, %v1026_v8 }
0x1e25   :  { %v1029_v10 = vpack.c.bf16 %v1028_v9, %v1028_v9 }
0x1e27   :  { %1031 = vrot.lane.b32.xlu1 %v1029_v10, %s1642_s1 }
0x1e99   :  { %v1032_v5 = vpop.permute.xlu1 %1031 }
0x1e9a   :  { %1285 = vmatmul.mubr.msk.bf16.vlgmr.msra.gmra.mrb[24].mxu0 %vm181_vm3, %v1032_v5 }
0x1e9b   :  { %1410 = vmatprep.mubr.msk.bf16.mxu0 %vm1639_vm0, %v1638_v0  ;;  %1407 = vmatpush3.bf16.msra.mxu0 %v1434_v48 }
0x1e9c   :  { %1408 = vmatprep.subr.bf16.mxu0 %v1638_v0 }
0x1e9f   :  { %1409 = vmatpush3.bf16.msra.mxu0 %v1435_v49 }
0x1f6d   :  { %v1070_v11 = vpop.f32.mrb[24].mxu0 }
0x1f6e   :  { %v1071_v12 = vadd.f32 %v1070_v11, %v1895_v30  ;;  %v1072_v13 = vpop.f32.mrb[25].mxu0 }
0x1f6f   :  { %v1073_v14 = vadd.f32 %v1072_v13, %v1897_v31  ;;  %v1074_v15 = vpop.f32.mrb[26].mxu0 }
0x1f70   :  { %1524 = vtanh.f32 %v1071_v12  ;;  %v1075_v16 = vpop.f32.mrb[27].mxu0  ;;  %v1287_v18 = vmul.f32 -1.442695, %v1071_v12 }
0x1f71   :  { %1286 = vst.msk [vmem:[%s1969_s10 + $0x4] sm:$0x3] %vm929_vm4, %v1073_v14 }
0x1f72   :  { %1526 = vpow2.f32 %v1287_v18 }
0x1f7a   :  { %v1525_v17 = vpop.eup %1524 }
0x1f7b   :  { %1088 = vrot.lane.b32.xlu0 %v1525_v17, %s1641_s0 }
0x1f7c   :  { %v1527_v19 = vpop.eup %1526 }
0x1f7d   :  { %v1082_v20 = vadd.f32 1.0, %v1527_v19 }
0x1f7f   :  { %1528 = vrcp.f32 %v1082_v20 }
0x1f89   :  { %v1529_v21 = vpop.eup %1528 }
0x1f8a   :  { %v1086_v24 = vmul.f32 %v1529_v21, %v1022_v4 }
0x1fed   :  { %v1089_v22 = vpop.permute.xlu0 %1088 }
0x1fee   :  { %v1091_v23 = vmul.f32 %v1529_v21, %v1089_v22 }
0x1ff0   :  { %1093 = vrot.lane.b32.xlu1 %v1091_v23, %s1642_s1 }
0x2062   :  { %v1094_v25 = vpop.permute.xlu1 %1093 }
0x2063   :  { %v1096_v26 = vadd.f32 %v1094_v25, %v1086_v24 }
0x2065   :  { %1530 = vtanh.f32 %v1096_v26 }
0x206f   :  { %v1531_v27 = vpop.eup %1530 }
0x2070   :  { %1099 = vrot.lane.b32.xlu0 %v1531_v27, %s1641_s0 }
0x20e2   :  { %v1100_v28 = vpop.permute.xlu0 %1099 }
0x20e3   :  { %v1102_v29 = vmul.f32 %v1529_v21, %v1100_v28 }
0x20e5   :  { %v1103_v32 = vpack.c.bf16 %v1102_v29, %v1102_v29 }
0x20e7   :  { %1105 = vrot.lane.b32.xlu1 %v1103_v32, %s1642_s1 }
0x2159   :  { %v1106_v33 = vpop.permute.xlu1 %1105 }
0x215a   :  { %1288 = vmatmul.mubr.msk.bf16.vlgmr.msra.gmra.mrb[24].mxu1 %vm181_vm3, %v1106_v33 }
0x222d   :  { %v1144_v34 = vpop.f32.mrb[24].mxu1 }
0x222e   :  { %v1145_v35 = vadd.f32 %v1144_v34, %v1895_v30  ;;  %v1146_v36 = vpop.f32.mrb[25].mxu1 }
0x222f   :  { %v1147_v37 = vadd.f32 %v1146_v36, %v1897_v31  ;;  %v1148_v38 = vpop.f32.mrb[26].mxu1 }
0x2230   :  { %1532 = vtanh.f32 %v1145_v35  ;;  %v1149_v39 = vpop.f32.mrb[27].mxu1  ;;  %v1290_v41 = vmul.f32 -1.442695, %v1145_v35 }
0x2231   :  { %1289 = vst.msk [vmem:[%s1969_s10 + $0x6] sm:$0x3] %vm929_vm4, %v1147_v37 }
0x2232   :  { %1534 = vpow2.f32 %v1290_v41 }
0x223a   :  { %v1533_v40 = vpop.eup %1532 }
0x223b   :  { %1162 = vrot.lane.b32.xlu0 %v1533_v40, %s1641_s0 }
0x223c   :  { %v1535_v42 = vpop.eup %1534 }
0x223d   :  { %v1156_v43 = vadd.f32 1.0, %v1535_v42 }
0x223f   :  { %1536 = vrcp.f32 %v1156_v43 }
0x2249   :  { %v1537_v30 = vpop.eup %1536 }
0x224a   :  { %v1160_v31 = vmul.f32 %v1537_v30, %v1096_v26 }
0x22ad   :  { %v1163_v44 = vpop.permute.xlu0 %1162 }
0x22ae   :  { %v1165_v45 = vmul.f32 %v1537_v30, %v1163_v44 }
0x22b0   :  { %1167 = vrot.lane.b32.xlu1 %v1165_v45, %s1642_s1 }
0x2322   :  { %v1168_v46 = vpop.permute.xlu1 %1167 }
0x2323   :  { %v1170_v47 = vadd.f32 %v1168_v46, %v1160_v31 }
0x2325   :  { %1538 = vtanh.f32 %v1170_v47 }
0x232f   :  { %v1539_v50 = vpop.eup %1538 }
0x2330   :  { %1173 = vrot.lane.b32.xlu0 %v1539_v50, %s1641_s0 }
0x23a2   :  { %v1174_v51 = vpop.permute.xlu0 %1173 }
0x23a3   :  { %v1176_v52 = vmul.f32 %v1537_v30, %v1174_v51 }
0x23a5   :  { %v1177_v53 = vpack.c.bf16 %v1176_v52, %v1176_v52 }
0x23a7   :  { %1185 = vrot.lane.b32.xlu1 %v1177_v53, %s1642_s1 }
0x2419   :  { %v1186_v54 = vpop.permute.xlu1 %1185 }
0x241a   :  { %1411 = vmatmul.mubr.msk.bf16.vlgmr.msra.gmra.mrb[28].mxu0 %vm181_vm3, %v1186_v54 }
0x24ed   :  { %v1236_v56 = vpop.f32.mrb[28].mxu0 }
0x24ee   :  { %v1237_v57 = vadd.f32 %v1291_v55, %v1236_v56  ;;  %v1412_v58 = vpop.f32.mrb[29].mxu0 }
0x24ef   :  { %v1239_v59 = vpop.f32.mrb[30].mxu0 }
0x24f0   :  { %1295 = vst.msk [vmem:[%s1969_s10 + $0x8] sm:$0x3] %vm929_vm4, %v1237_v57  ;;  %v1413_v0 = vpop.f32.mrb[31].mxu0 }
0x24f1   :  { %1248 = vsyncpa [#allocation4], 1 }
0x24f2   :  { %1249 = vsyncpa [#allocation6], 1 }
0x24f3   :  { %1250 = vsyncpa [#allocation9], 1 }

</bundles_post_ra>
